<compile_context>
chip_gen: v7x
topology: tpu7x:2x2x1
jax: 0.10.0
libtpu: 0.0.40
codegen_flags: <defaults>
</compile_context>

<pallas_src>
import functools
import math

import jax
import jax.numpy as jnp
from jax.experimental import pallas as pl
from jax.experimental.pallas import tpu as pltpu


def _round_up(x, m):
    return ((x + m - 1) // m) * m


# ---------------------------------------------------------------------------
# Kernel 1: hoisted (non-recurrent) input projection
#   x_flat (R, Din) @ W_i (Din, 3Hp) + b_x (1, 3Hp)  ->  (R, 3Hp)
# ---------------------------------------------------------------------------
def _input_proj_kernel(x_ref, w_ref, b_ref, o_ref):
    x = x_ref[...].astype(w_ref.dtype)        # bf16 MXU operand (no-op for f32)
    o_ref[...] = (
        jnp.dot(x, w_ref[...], preferred_element_type=jnp.float32) + b_ref[...]
    ).astype(o_ref.dtype)


def _pick_row_tile(rows, cap=512):
    # `rows` is a multiple of 8 by construction (Bp mult of 8, Tp mult of Tc).
    # Cap at 512 rows (safe for v7x's 64 MiB VMEM with double-buffering).
    if rows <= cap:
        return rows
    for cand in range(cap, 7, -8):
        if rows % cand == 0:
            return cand
    return 8


def _input_projection(x_flat, w_i, b_x):
    R, Din = x_flat.shape
    threeHp = w_i.shape[1]
    rt = _pick_row_tile(R)
    return pl.pallas_call(
        _input_proj_kernel,
        out_shape=jax.ShapeDtypeStruct((R, threeHp), jnp.float32),
        grid=(R // rt,),
        in_specs=[
            pl.BlockSpec((rt, Din), lambda r: (r, 0)),
            pl.BlockSpec((Din, threeHp), lambda r: (0, 0)),
            pl.BlockSpec((1, threeHp), lambda r: (0, 0)),
        ],
        out_specs=pl.BlockSpec((rt, threeHp), lambda r: (r, 0)),
        compiler_params=pltpu.CompilerParams(dimension_semantics=("parallel",)),
    )(x_flat, w_i, b_x)


# ---------------------------------------------------------------------------
# Kernel 2: sequential GRU recurrence, chunked over time.
#   xp_ref : (Tc, Bp, 3Hp)  pre-projected inputs (+ folded input-side biases)
#   wh_ref : (Hp, 3Hp)      fused hidden weights [W_hr^T | W_hz^T | W_hn^T]
#   bn_ref : (1, Hp)        n-gate hidden bias b_hn (must stay inside r*(.))
#   out_ref: (Tc, Bp, Hp)
#   h_ref  : (Bp, Hp)       VMEM scratch carrying hidden state across chunks
# ---------------------------------------------------------------------------
def _gru_recurrent_kernel(xp_ref, wh_ref, bn_ref, out_ref, h_ref):
    @pl.when(pl.program_id(0) == 0)
    def _():
        # PyTorch default: zero initial hidden state.
        h_ref[...] = jnp.zeros_like(h_ref)

    Tc, Bp, threeHp = xp_ref.shape
    Hp = threeHp // 3

    w_h = wh_ref[...]                                   # (Hp, 3Hp), hoisted
    b_hn = jnp.broadcast_to(bn_ref[...], (Bp, Hp))      # broadcast hoisted

    h = h_ref[...]                                      # (Bp, Hp) f32 carry
    # Tc is small and static: fully unrolled at trace time.  With Bp a
    # multiple of 8 and Hp a multiple of 128, xp_ref[ti] / out_ref[ti] are
    # full unmasked vreg-tile accesses and all gate slices are lane-aligned.
    for ti in range(Tc):
        gx = xp_ref[ti]                                 # (Bp, 3Hp) dense load
        gh = jnp.dot(h.astype(w_h.dtype), w_h,          # bf16 MXU, f32 accum
                     preferred_element_type=jnp.float32)
        rz = jax.nn.sigmoid(gx[:, : 2 * Hp] + gh[:, : 2 * Hp])   # fused r,z
        r = rz[:, :Hp]
        z = rz[:, Hp:]
        n = jnp.tanh(gx[:, 2 * Hp:] + r * (gh[:, 2 * Hp:] + b_hn))
        h = (1.0 - z) * n + z * h
        out_ref[ti] = h.astype(out_ref.dtype)           # dense (8,128) store
    h_ref[...] = h


def _gru_recurrent(xp, w_h, b_hn, Tc):
    Tp, Bp, threeHp = xp.shape
    Hp = threeHp // 3
    return pl.pallas_call(
        _gru_recurrent_kernel,
        out_shape=jax.ShapeDtypeStruct((Tp, Bp, Hp), jnp.float32),
        grid=(Tp // Tc,),
        in_specs=[
            pl.BlockSpec((Tc, Bp, threeHp), lambda c: (c, 0, 0)),
            pl.BlockSpec((Hp, threeHp), lambda c: (0, 0)),
            pl.BlockSpec((1, Hp), lambda c: (0, 0)),
        ],
        out_specs=pl.BlockSpec((Tc, Bp, Hp), lambda c: (c, 0, 0)),
        scratch_shapes=[pltpu.VMEM((Bp, Hp), jnp.float32)],
        compiler_params=pltpu.CompilerParams(
            dimension_semantics=("arbitrary",)),   # time recurrence is serial
    )(xp, w_h, b_hn)


# ---------------------------------------------------------------------------
# Parameters (PyTorch-style init) + forward wrapper mirroring NoiseGen.
# PyTorch GRU cell (gate order r, z, n):
#   r = sigmoid(x W_ir^T + b_ir + h W_hr^T + b_hr)
#   z = sigmoid(x W_iz^T + b_iz + h W_hz^T + b_hz)
#   n = tanh   (x W_in^T + b_in + r * (h W_hn^T + b_hn))
#   h' = (1 - z) * n + z * h
# ---------------------------------------------------------------------------
def init_noisegen_params(key, input_size, output_size, n_layers):
    """U(-1/sqrt(H), 1/sqrt(H)) init like torch.nn.GRU.  Stores both the raw
    PyTorch-layout tensors (for the reference) and fused, 128-lane-padded
    kernel params."""
    H = output_size
    Hp = _round_up(H, 128)
    bound = 1.0 / math.sqrt(H)
    layers = []
    for layer in range(n_layers):
        din = input_size if layer == 0 else H
        din_p = input_size if layer == 0 else Hp     # later layers eat padded x
        key, k1, k2, k3, k4 = jax.random.split(key, 5)
        w_ih = jax.random.uniform(k1, (3 * H, din), jnp.float32, -bound, bound)
        w_hh = jax.random.uniform(k2, (3 * H, H), jnp.float32, -bound, bound)
        b_ih = jax.random.uniform(k3, (3 * H,), jnp.float32, -bound, bound)
        b_hh = jax.random.uniform(k4, (3 * H,), jnp.float32, -bound, bound)

        # Fused + lane-padded kernel params: gate g lives in lanes
        # [g*Hp, g*Hp+H); everything else is zero (zero rows for padded
        # hidden/input lanes keep the padding lanes inert).
        w_i = jnp.zeros((din_p, 3 * Hp), jnp.float32)
        w_h = jnp.zeros((Hp, 3 * Hp), jnp.float32)
        for g in range(3):
            w_i = w_i.at[:din, g * Hp:g * Hp + H].set(w_ih[g * H:(g + 1) * H].T)
            w_h = w_h.at[:H, g * Hp:g * Hp + H].set(w_hh[g * H:(g + 1) * H].T)

        # Input-side bias: fold b_hr, b_hz (they sit outside r*(.)), keep b_in.
        b_x = jnp.zeros((1, 3 * Hp), jnp.float32)
        b_x = b_x.at[0, 0:H].set(b_ih[:H] + b_hh[:H])
        b_x = b_x.at[0, Hp:Hp + H].set(b_ih[H:2 * H] + b_hh[H:2 * H])
        b_x = b_x.at[0, 2 * Hp:2 * Hp + H].set(b_ih[2 * H:])
        # Hidden-side bias: only b_hn remains (must stay inside r*(.)).
        b_hn = jnp.zeros((1, Hp), jnp.float32).at[0, :H].set(b_hh[2 * H:])

        layers.append(dict(w_ih=w_ih, w_hh=w_hh, b_ih=b_ih, b_hh=b_hh,
                           w_i=w_i, w_h=w_h, b_x=b_x, b_hn=b_hn))
    return layers


def noisegen_forward(params, x_btd, *, time_chunk=32, mxu_dtype=jnp.bfloat16):
    """x_btd: (B, T, input_size), batch_first like the PyTorch module.
    Returns (B, T, output_size), i.e. rnn(x)[0].

    mxu_dtype=jnp.bfloat16 casts only the matmul operands (weights + the
    activation operand of each dot); the hidden-state carry and all gate math
    stay f32.  Pass jnp.float32 for bit-faithful-to-f32 results."""
    B, T, _ = x_btd.shape
    H = params[0]["w_hh"].shape[1]           # real hidden size
    Hp = params[0]["w_h"].shape[0]           # 128-lane-padded hidden size
    Bp = _round_up(B, 8)                     # sublane-dense batch
    Tc = min(_round_up(time_chunk, 8), _round_up(T, 8))
    Tp = _round_up(T, Tc)                    # pad T, don't shrink the chunk

    # One boundary relayout on the raw (smallest) tensor; intermediates stay
    # in (T, Bp, .) across all layers so the recurrence gets dense vreg tiles.
    x = jnp.transpose(x_btd, (1, 0, 2)).astype(jnp.float32)       # (T, B, Din)
    x = jnp.pad(x, ((0, Tp - T), (0, Bp - B), (0, 0)))            # (Tp, Bp, Din)

    for p in params:
        din = p["w_i"].shape[0]
        # 1) hoisted input projection: one big matmul over the whole sequence.
        xp = _input_projection(x.reshape(Tp * Bp, din),
                               p["w_i"].astype(mxu_dtype), p["b_x"])
        xp = xp.reshape(Tp, Bp, 3 * Hp)
        # 2) chunked sequential recurrence.
        x = _gru_recurrent(xp, p["w_h"].astype(mxu_dtype), p["b_hn"], Tc)

    return jnp.transpose(x[:T, :B, :H], (1, 0, 2))                # (B, T, H)


# ---------------------------------------------------------------------------
# Pure-JAX reference in the original (un-fused, un-padded) PyTorch form.
# ---------------------------------------------------------------------------
def noisegen_reference(params, x_btd):
    x = jnp.transpose(x_btd, (1, 0, 2)).astype(jnp.float32)   # (T, B, Din)
    for p in params:
        w_ih, w_hh, b_ih, b_hh = p["w_ih"], p["w_hh"], p["b_ih"], p["b_hh"]
        H = w_hh.shape[1]
        B = x.shape[1]
        w_ir, w_iz, w_in = w_ih[:H], w_ih[H:2 * H], w_ih[2 * H:]
        w_hr, w_hz, w_hn = w_hh[:H], w_hh[H:2 * H], w_hh[2 * H:]
        b_ir, b_iz, b_in = b_ih[:H], b_ih[H:2 * H], b_ih[2 * H:]
        b_hr, b_hz, b_hn = b_hh[:H], b_hh[H:2 * H], b_hh[2 * H:]

        def step(h, x_t):
            r = jax.nn.sigmoid(x_t @ w_ir.T + b_ir + h @ w_hr.T + b_hr)
            z = jax.nn.sigmoid(x_t @ w_iz.T + b_iz + h @ w_hz.T + b_hz)
            n = jnp.tanh(x_t @ w_in.T + b_in + r * (h @ w_hn.T + b_hn))
            h_new = (1.0 - z) * n + z * h
            return h_new, h_new

        _, ys = jax.lax.scan(step, jnp.zeros((B, H), jnp.float32), x)
        x = ys
    return jnp.transpose(x, (1, 0, 2))


if __name__ == "__main__":
    # Shapes consistent with NoiseGen(input_size, output_size, n_layers).
    input_size, output_size, n_layers = 16, 32, 2

    key = jax.random.PRNGKey(0)
    key_p, key_x1, key_x2 = jax.random.split(key, 3)
    params = init_noisegen_params(key_p, input_size, output_size, n_layers)

    fwd_bf16 = jax.jit(functools.partial(noisegen_forward,
                                         mxu_dtype=jnp.bfloat16))
    fwd_f32 = jax.jit(functools.partial(noisegen_forward,
                                        mxu_dtype=jnp.float32))

    # Case 1: B=2, T=8 (primary config).
    x1 = jax.random.normal(key_x1, (2, 8, input_size), jnp.float32)
    out_bf16 = jax.block_until_ready(fwd_bf16(params, x1))
    out_f32 = jax.block_until_ready(fwd_f32(params, x1))
    ref1 = noisegen_reference(params, x1)
    assert out_bf16.shape == (2, 8, output_size)
    assert jnp.allclose(out_f32, ref1, atol=1e-4, rtol=1e-4), "f32 mismatch"
    assert jnp.allclose(out_bf16, ref1, atol=3e-2, rtol=3e-2), "bf16 mismatch"

    # Case 2: awkward B=3, T=13 — exercises batch/time/lane padding paths.
    x2 = jax.random.normal(key_x2, (3, 13, input_size), jnp.float32)
    out2 = jax.block_until_ready(fwd_f32(params, x2))
    ref2 = noisegen_reference(params, x2)
    assert out2.shape == (3, 13, output_size)
    assert jnp.allclose(out2, ref2, atol=1e-4, rtol=1e-4), "padded-case mismatch"

    print("KERNEL_OK")
</pallas_src>

<mosaic_0001>
module attributes {stable_mosaic.version = 11 : i64} {
  func.func @_input_proj_kernel(%arg0: i32, %arg1: memref<64x16xf32, #tpu.memory_space<vmem>>, %arg2: memref<16x384xbf16, #tpu.memory_space<vmem>>, %arg3: memref<1x384xf32, #tpu.memory_space<vmem>>, %arg4: memref<64x384xf32, #tpu.memory_space<vmem>>) attributes {dimension_semantics = [#tpu.dimension_semantics<parallel>], iteration_bounds = array<i64: 1>, scalar_prefetch = 0 : i64, scratch_operands = 0 : i64, tpu.core_type = #tpu.core_type<tc>, window_params = [{transform_indices = @transform_0, window_bounds = array<i64: 64, 16>}, {pipeline_mode = #tpu.pipeline_mode<synchronous>, transform_indices = @transform_1, window_bounds = array<i64: 16, 384>}, {pipeline_mode = #tpu.pipeline_mode<synchronous>, transform_indices = @transform_2, window_bounds = array<i64: 1, 384>}, {transform_indices = @transform_3, window_bounds = array<i64: 64, 384>}]} {
    %c0 = arith.constant 0 : index
    %c0_0 = arith.constant 0 : index
    %0 = vector.load %arg1[%c0, %c0_0] : memref<64x16xf32, #tpu.memory_space<vmem>>, vector<64x16xf32>
    %1 = arith.truncf %0 : vector<64x16xf32> to vector<64x16xbf16>
    %c0_1 = arith.constant 0 : index
    %c0_2 = arith.constant 0 : index
    %2 = vector.load %arg2[%c0_1, %c0_2] : memref<16x384xbf16, #tpu.memory_space<vmem>>, vector<16x384xbf16>
    %cst = arith.constant dense<0.000000e+00> : vector<64x384xf32>
    %3 = tpu.matmul %1, %2, %cst {dimension_numbers = #tpu.dot_dimension_numbers<[1], [0], [0], [1], [0, 0, 1, 1], [], []>} : vector<64x16xbf16>, vector<16x384xbf16>, vector<64x384xf32> -> vector<64x384xf32>
    %c0_3 = arith.constant 0 : index
    %c0_4 = arith.constant 0 : index
    %4 = vector.load %arg3[%c0_3, %c0_4] : memref<1x384xf32, #tpu.memory_space<vmem>>, vector<1x384xf32>
    %5 = vector.broadcast %4 : vector<1x384xf32> to vector<64x384xf32>
    %6 = arith.addf %3, %5 : vector<64x384xf32>
    %c0_5 = arith.constant 0 : index
    %c0_6 = arith.constant 0 : index
    %7 = vector.load %arg4[%c0_5, %c0_6] : memref<64x384xf32, #tpu.memory_space<vmem>>, vector<64x384xf32>
    tpu.vector_store %arg4[%c0_5, %c0_6], %6 {strides = array<i32>} : memref<64x384xf32, #tpu.memory_space<vmem>>, vector<64x384xf32>,
    return
  }
  func.func @transform_0(%arg0: i32) -> (i32, i32) {
    %c0_i32 = arith.constant 0 : i32
    %c0_i32_0 = arith.constant 0 : i32
    return %arg0, %c0_i32 : i32, i32
  }
  func.func @transform_1(%arg0: i32) -> (i32, i32) {
    %c0_i32 = arith.constant 0 : i32
    %c0_i32_0 = arith.constant 0 : i32
    %c0_i32_1 = arith.constant 0 : i32
    return %c0_i32, %c0_i32_0 : i32, i32
  }
  func.func @transform_2(%arg0: i32) -> (i32, i32) {
    %c0_i32 = arith.constant 0 : i32
    %c0_i32_0 = arith.constant 0 : i32
    %c0_i32_1 = arith.constant 0 : i32
    return %c0_i32, %c0_i32_0 : i32, i32
  }
  func.func @transform_3(%arg0: i32) -> (i32, i32) {
    %c0_i32 = arith.constant 0 : i32
    %c0_i32_0 = arith.constant 0 : i32
    return %arg0, %c0_i32 : i32, i32
  }
}

module attributes {stable_mosaic.version = 11 : i64} {
  func.func @_input_proj_kernel(%arg0: i32, %arg1: memref<64x128xf32, #tpu.memory_space<vmem>>, %arg2: memref<128x384xbf16, #tpu.memory_space<vmem>>, %arg3: memref<1x384xf32, #tpu.memory_space<vmem>>, %arg4: memref<64x384xf32, #tpu.memory_space<vmem>>) attributes {dimension_semantics = [#tpu.dimension_semantics<parallel>], iteration_bounds = array<i64: 1>, scalar_prefetch = 0 : i64, scratch_operands = 0 : i64, tpu.core_type = #tpu.core_type<tc>, window_params = [{transform_indices = @transform_0, window_bounds = array<i64: 64, 128>}, {pipeline_mode = #tpu.pipeline_mode<synchronous>, transform_indices = @transform_1, window_bounds = array<i64: 128, 384>}, {pipeline_mode = #tpu.pipeline_mode<synchronous>, transform_indices = @transform_2, window_bounds = array<i64: 1, 384>}, {transform_indices = @transform_3, window_bounds = array<i64: 64, 384>}]} {
    %c0 = arith.constant 0 : index
    %c0_0 = arith.constant 0 : index
    %0 = vector.load %arg1[%c0, %c0_0] : memref<64x128xf32, #tpu.memory_space<vmem>>, vector<64x128xf32>
    %1 = arith.truncf %0 : vector<64x128xf32> to vector<64x128xbf16>
    %c0_1 = arith.constant 0 : index
    %c0_2 = arith.constant 0 : index
    %2 = vector.load %arg2[%c0_1, %c0_2] : memref<128x384xbf16, #tpu.memory_space<vmem>>, vector<128x384xbf16>
    %cst = arith.constant dense<0.000000e+00> : vector<64x384xf32>
    %3 = tpu.matmul %1, %2, %cst {dimension_numbers = #tpu.dot_dimension_numbers<[1], [0], [0], [1], [0, 0, 1, 1], [], []>} : vector<64x128xbf16>, vector<128x384xbf16>, vector<64x384xf32> -> vector<64x384xf32>
    %c0_3 = arith.constant 0 : index
    %c0_4 = arith.constant 0 : index
    %4 = vector.load %arg3[%c0_3, %c0_4] : memref<1x384xf32, #tpu.memory_space<vmem>>, vector<1x384xf32>
    %5 = vector.broadcast %4 : vector<1x384xf32> to vector<64x384xf32>
    %6 = arith.addf %3, %5 : vector<64x384xf32>
    %c0_5 = arith.constant 0 : index
    %c0_6 = arith.constant 0 : index
    %7 = vector.load %arg4[%c0_5, %c0_6] : memref<64x384xf32, #tpu.memory_space<vmem>>, vector<64x384xf32>
    tpu.vector_store %arg4[%c0_5, %c0_6], %6 {strides = array<i32>} : memref<64x384xf32, #tpu.memory_space<vmem>>, vector<64x384xf32>,
    return
  }
  func.func @transform_0(%arg0: i32) -> (i32, i32) {
    %c0_i32 = arith.constant 0 : i32
    %c0_i32_0 = arith.constant 0 : i32
    return %arg0, %c0_i32 : i32, i32
  }
  func.func @transform_1(%arg0: i32) -> (i32, i32) {
    %c0_i32 = arith.constant 0 : i32
    %c0_i32_0 = arith.constant 0 : i32
    %c0_i32_1 = arith.constant 0 : i32
    return %c0_i32, %c0_i32_0 : i32, i32
  }
  func.func @transform_2(%arg0: i32) -> (i32, i32) {
    %c0_i32 = arith.constant 0 : i32
    %c0_i32_0 = arith.constant 0 : i32
    %c0_i32_1 = arith.constant 0 : i32
    return %c0_i32, %c0_i32_0 : i32, i32
  }
  func.func @transform_3(%arg0: i32) -> (i32, i32) {
    %c0_i32 = arith.constant 0 : i32
    %c0_i32_0 = arith.constant 0 : i32
    return %arg0, %c0_i32 : i32, i32
  }
}

module attributes {stable_mosaic.version = 11 : i64} {
  func.func @_gru_recurrent_kernel(%arg0: i32, %arg1: memref<8x8x384xf32, #tpu.memory_space<vmem>>, %arg2: memref<128x384xbf16, #tpu.memory_space<vmem>>, %arg3: memref<1x128xf32, #tpu.memory_space<vmem>>, %arg4: memref<8x8x128xf32, #tpu.memory_space<vmem>>, %arg5: memref<8x128xf32, #tpu.memory_space<vmem>>) attributes {dimension_semantics = [#tpu.dimension_semantics<arbitrary>], iteration_bounds = array<i64: 1>, scalar_prefetch = 0 : i64, scratch_operands = 1 : i64, tpu.core_type = #tpu.core_type<tc>, window_params = [{transform_indices = @transform_0, window_bounds = array<i64: 8, 8, 384>}, {pipeline_mode = #tpu.pipeline_mode<synchronous>, transform_indices = @transform_1, window_bounds = array<i64: 128, 384>}, {pipeline_mode = #tpu.pipeline_mode<synchronous>, transform_indices = @transform_2, window_bounds = array<i64: 1, 128>}, {transform_indices = @transform_3, window_bounds = array<i64: 8, 8, 128>}]} {
    %c0_i32 = arith.constant 0 : i32
    %0 = arith.cmpi eq, %arg0, %c0_i32 : i32
    %1 = arith.extui %0 : i1 to i32
    %c0_i32_0 = arith.constant 0 : i32
    %2 = arith.cmpi ne, %1, %c0_i32_0 : i32
    scf.if %2 {
      %cst_72 = arith.constant 0.000000e+00 : f32
      %233 = vector.broadcast %cst_72 : f32 to vector<8x128xf32>
      %c0_73 = arith.constant 0 : index
      %c0_74 = arith.constant 0 : index
      %234 = vector.load %arg5[%c0_73, %c0_74] : memref<8x128xf32, #tpu.memory_space<vmem>>, vector<8x128xf32>
      tpu.vector_store %arg5[%c0_73, %c0_74], %233 {strides = array<i32>} : memref<8x128xf32, #tpu.memory_space<vmem>>, vector<8x128xf32>,
    } else {
    }
    %c0 = arith.constant 0 : index
    %c0_1 = arith.constant 0 : index
    %3 = vector.load %arg2[%c0, %c0_1] : memref<128x384xbf16, #tpu.memory_space<vmem>>, vector<128x384xbf16>
    %c0_2 = arith.constant 0 : index
    %c0_3 = arith.constant 0 : index
    %4 = vector.load %arg3[%c0_2, %c0_3] : memref<1x128xf32, #tpu.memory_space<vmem>>, vector<1x128xf32>
    %5 = vector.shape_cast %4 : vector<1x128xf32> to vector<1x128xf32>
    %6 = vector.broadcast %5 : vector<1x128xf32> to vector<8x128xf32>
    %c0_4 = arith.constant 0 : index
    %c0_5 = arith.constant 0 : index
    %7 = vector.load %arg5[%c0_4, %c0_5] : memref<8x128xf32, #tpu.memory_space<vmem>>, vector<8x128xf32>
    %c0_6 = arith.constant 0 : index
    %c0_7 = arith.constant 0 : index
    %c0_8 = arith.constant 0 : index
    %8 = vector.load %arg1[%c0_6, %c0_7, %c0_8] : memref<8x8x384xf32, #tpu.memory_space<vmem>>, vector<1x8x384xf32>
    %9 = vector.shape_cast %8 : vector<1x8x384xf32> to vector<8x384xf32>
    %10 = arith.truncf %7 : vector<8x128xf32> to vector<8x128xbf16>
    %cst = arith.constant dense<0.000000e+00> : vector<8x384xf32>
    %11 = tpu.matmul %10, %3, %cst {dimension_numbers = #tpu.dot_dimension_numbers<[1], [0], [0], [1], [0, 0, 1, 1], [], []>} : vector<8x128xbf16>, vector<128x384xbf16>, vector<8x384xf32> -> vector<8x384xf32>
    %12 = vector.extract_strided_slice %9 {offsets = [0, 0], sizes = [8, 256], strides = [1, 1]} : vector<8x384xf32> to vector<8x256xf32>
    %13 = vector.extract_strided_slice %11 {offsets = [0, 0], sizes = [8, 256], strides = [1, 1]} : vector<8x384xf32> to vector<8x256xf32>
    %14 = arith.addf %12, %13 : vector<8x256xf32>
    %15 = arith.negf %14 : vector<8x256xf32>
    %16 = math.exp %15 : vector<8x256xf32>
    %cst_9 = arith.constant 1.000000e+00 : f32
    %17 = vector.broadcast %cst_9 : f32 to vector<8x256xf32>
    %18 = arith.addf %17, %16 : vector<8x256xf32>
    %19 = arith.divf %17, %18 : vector<8x256xf32>
    %20 = vector.extract_strided_slice %19 {offsets = [0, 0], sizes = [8, 128], strides = [1, 1]} : vector<8x256xf32> to vector<8x128xf32>
    %21 = vector.extract_strided_slice %19 {offsets = [0, 128], sizes = [8, 128], strides = [1, 1]} : vector<8x256xf32> to vector<8x128xf32>
    %22 = vector.extract_strided_slice %9 {offsets = [0, 256], sizes = [8, 128], strides = [1, 1]} : vector<8x384xf32> to vector<8x128xf32>
    %23 = vector.extract_strided_slice %11 {offsets = [0, 256], sizes = [8, 128], strides = [1, 1]} : vector<8x384xf32> to vector<8x128xf32>
    %24 = arith.addf %23, %6 : vector<8x128xf32>
    %25 = arith.mulf %20, %24 : vector<8x128xf32>
    %26 = arith.addf %22, %25 : vector<8x128xf32>
    %27 = math.tanh %26 : vector<8x128xf32>
    %cst_10 = arith.constant 1.000000e+00 : f32
    %28 = vector.broadcast %cst_10 : f32 to vector<8x128xf32>
    %29 = arith.subf %28, %21 : vector<8x128xf32>
    %30 = arith.mulf %29, %27 : vector<8x128xf32>
    %31 = arith.mulf %21, %7 : vector<8x128xf32>
    %32 = arith.addf %30, %31 : vector<8x128xf32>
    %c0_11 = arith.constant 0 : index
    %c0_12 = arith.constant 0 : index
    %c0_13 = arith.constant 0 : index
    %33 = vector.load %arg4[%c0_11, %c0_12, %c0_13] : memref<8x8x128xf32, #tpu.memory_space<vmem>>, vector<1x8x128xf32>
    %34 = vector.shape_cast %33 : vector<1x8x128xf32> to vector<8x128xf32>
    %35 = vector.shape_cast %32 : vector<8x128xf32> to vector<1x8x128xf32>
    tpu.vector_store %arg4[%c0_11, %c0_12, %c0_13], %35 {strides = array<i32>} : memref<8x8x128xf32, #tpu.memory_space<vmem>>, vector<1x8x128xf32>,
    %c1 = arith.constant 1 : index
    %c0_14 = arith.constant 0 : index
    %c0_15 = arith.constant 0 : index
    %36 = vector.load %arg1[%c1, %c0_14, %c0_15] : memref<8x8x384xf32, #tpu.memory_space<vmem>>, vector<1x8x384xf32>
    %37 = vector.shape_cast %36 : vector<1x8x384xf32> to vector<8x384xf32>
    %38 = arith.truncf %32 : vector<8x128xf32> to vector<8x128xbf16>
    %cst_16 = arith.constant dense<0.000000e+00> : vector<8x384xf32>
    %39 = tpu.matmul %38, %3, %cst_16 {dimension_numbers = #tpu.dot_dimension_numbers<[1], [0], [0], [1], [0, 0, 1, 1], [], []>} : vector<8x128xbf16>, vector<128x384xbf16>, vector<8x384xf32> -> vector<8x384xf32>
    %40 = vector.extract_strided_slice %37 {offsets = [0, 0], sizes = [8, 256], strides = [1, 1]} : vector<8x384xf32> to vector<8x256xf32>
    %41 = vector.extract_strided_slice %39 {offsets = [0, 0], sizes = [8, 256], strides = [1, 1]} : vector<8x384xf32> to vector<8x256xf32>
    %42 = arith.addf %40, %41 : vector<8x256xf32>
    %43 = arith.negf %42 : vector<8x256xf32>
    %44 = math.exp %43 : vector<8x256xf32>
    %cst_17 = arith.constant 1.000000e+00 : f32
    %45 = vector.broadcast %cst_17 : f32 to vector<8x256xf32>
    %46 = arith.addf %45, %44 : vector<8x256xf32>
    %47 = arith.divf %45, %46 : vector<8x256xf32>
    %48 = vector.extract_strided_slice %47 {offsets = [0, 0], sizes = [8, 128], strides = [1, 1]} : vector<8x256xf32> to vector<8x128xf32>
    %49 = vector.extract_strided_slice %47 {offsets = [0, 128], sizes = [8, 128], strides = [1, 1]} : vector<8x256xf32> to vector<8x128xf32>
    %50 = vector.extract_strided_slice %37 {offsets = [0, 256], sizes = [8, 128], strides = [1, 1]} : vector<8x384xf32> to vector<8x128xf32>
    %51 = vector.extract_strided_slice %39 {offsets = [0, 256], sizes = [8, 128], strides = [1, 1]} : vector<8x384xf32> to vector<8x128xf32>
    %52 = arith.addf %51, %6 : vector<8x128xf32>
    %53 = arith.mulf %48, %52 : vector<8x128xf32>
    %54 = arith.addf %50, %53 : vector<8x128xf32>
    %55 = math.tanh %54 : vector<8x128xf32>
    %cst_18 = arith.constant 1.000000e+00 : f32
    %56 = vector.broadcast %cst_18 : f32 to vector<8x128xf32>
    %57 = arith.subf %56, %49 : vector<8x128xf32>
    %58 = arith.mulf %57, %55 : vector<8x128xf32>
    %59 = arith.mulf %49, %32 : vector<8x128xf32>
    %60 = arith.addf %58, %59 : vector<8x128xf32>
    %c1_19 = arith.constant 1 : index
    %c0_20 = arith.constant 0 : index
    %c0_21 = arith.constant 0 : index
    %61 = vector.load %arg4[%c1_19, %c0_20, %c0_21] : memref<8x8x128xf32, #tpu.memory_space<vmem>>, vector<1x8x128xf32>
    %62 = vector.shape_cast %61 : vector<1x8x128xf32> to vector<8x128xf32>
    %63 = vector.shape_cast %60 : vector<8x128xf32> to vector<1x8x128xf32>
    tpu.vector_store %arg4[%c1_19, %c0_20, %c0_21], %63 {strides = array<i32>} : memref<8x8x128xf32, #tpu.memory_space<vmem>>, vector<1x8x128xf32>,
    %c2 = arith.constant 2 : index
    %c0_22 = arith.constant 0 : index
    %c0_23 = arith.constant 0 : index
    %64 = vector.load %arg1[%c2, %c0_22, %c0_23] : memref<8x8x384xf32, #tpu.memory_space<vmem>>, vector<1x8x384xf32>
    %65 = vector.shape_cast %64 : vector<1x8x384xf32> to vector<8x384xf32>
    %66 = arith.truncf %60 : vector<8x128xf32> to vector<8x128xbf16>
    %cst_24 = arith.constant dense<0.000000e+00> : vector<8x384xf32>
    %67 = tpu.matmul %66, %3, %cst_24 {dimension_numbers = #tpu.dot_dimension_numbers<[1], [0], [0], [1], [0, 0, 1, 1], [], []>} : vector<8x128xbf16>, vector<128x384xbf16>, vector<8x384xf32> -> vector<8x384xf32>
    %68 = vector.extract_strided_slice %65 {offsets = [0, 0], sizes = [8, 256], strides = [1, 1]} : vector<8x384xf32> to vector<8x256xf32>
    %69 = vector.extract_strided_slice %67 {offsets = [0, 0], sizes = [8, 256], strides = [1, 1]} : vector<8x384xf32> to vector<8x256xf32>
    %70 = arith.addf %68, %69 : vector<8x256xf32>
    %71 = arith.negf %70 : vector<8x256xf32>
    %72 = math.exp %71 : vector<8x256xf32>
    %cst_25 = arith.constant 1.000000e+00 : f32
    %73 = vector.broadcast %cst_25 : f32 to vector<8x256xf32>
    %74 = arith.addf %73, %72 : vector<8x256xf32>
    %75 = arith.divf %73, %74 : vector<8x256xf32>
    %76 = vector.extract_strided_slice %75 {offsets = [0, 0], sizes = [8, 128], strides = [1, 1]} : vector<8x256xf32> to vector<8x128xf32>
    %77 = vector.extract_strided_slice %75 {offsets = [0, 128], sizes = [8, 128], strides = [1, 1]} : vector<8x256xf32> to vector<8x128xf32>
    %78 = vector.extract_strided_slice %65 {offsets = [0, 256], sizes = [8, 128], strides = [1, 1]} : vector<8x384xf32> to vector<8x128xf32>
    %79 = vector.extract_strided_slice %67 {offsets = [0, 256], sizes = [8, 128], strides = [1, 1]} : vector<8x384xf32> to vector<8x128xf32>
    %80 = arith.addf %79, %6 : vector<8x128xf32>
    %81 = arith.mulf %76, %80 : vector<8x128xf32>
    %82 = arith.addf %78, %81 : vector<8x128xf32>
    %83 = math.tanh %82 : vector<8x128xf32>
    %cst_26 = arith.constant 1.000000e+00 : f32
    %84 = vector.broadcast %cst_26 : f32 to vector<8x128xf32>
    %85 = arith.subf %84, %77 : vector<8x128xf32>
    %86 = arith.mulf %85, %83 : vector<8x128xf32>
    %87 = arith.mulf %77, %60 : vector<8x128xf32>
    %88 = arith.addf %86, %87 : vector<8x128xf32>
    %c2_27 = arith.constant 2 : index
    %c0_28 = arith.constant 0 : index
    %c0_29 = arith.constant 0 : index
    %89 = vector.load %arg4[%c2_27, %c0_28, %c0_29] : memref<8x8x128xf32, #tpu.memory_space<vmem>>, vector<1x8x128xf32>
    %90 = vector.shape_cast %89 : vector<1x8x128xf32> to vector<8x128xf32>
    %91 = vector.shape_cast %88 : vector<8x128xf32> to vector<1x8x128xf32>
    tpu.vector_store %arg4[%c2_27, %c0_28, %c0_29], %91 {strides = array<i32>} : memref<8x8x128xf32, #tpu.memory_space<vmem>>, vector<1x8x128xf32>,
    %c3 = arith.constant 3 : index
    %c0_30 = arith.constant 0 : index
    %c0_31 = arith.constant 0 : index
    %92 = vector.load %arg1[%c3, %c0_30, %c0_31] : memref<8x8x384xf32, #tpu.memory_space<vmem>>, vector<1x8x384xf32>
    %93 = vector.shape_cast %92 : vector<1x8x384xf32> to vector<8x384xf32>
    %94 = arith.truncf %88 : vector<8x128xf32> to vector<8x128xbf16>
    %cst_32 = arith.constant dense<0.000000e+00> : vector<8x384xf32>
    %95 = tpu.matmul %94, %3, %cst_32 {dimension_numbers = #tpu.dot_dimension_numbers<[1], [0], [0], [1], [0, 0, 1, 1], [], []>} : vector<8x128xbf16>, vector<128x384xbf16>, vector<8x384xf32> -> vector<8x384xf32>
    %96 = vector.extract_strided_slice %93 {offsets = [0, 0], sizes = [8, 256], strides = [1, 1]} : vector<8x384xf32> to vector<8x256xf32>
    %97 = vector.extract_strided_slice %95 {offsets = [0, 0], sizes = [8, 256], strides = [1, 1]} : vector<8x384xf32> to vector<8x256xf32>
    %98 = arith.addf %96, %97 : vector<8x256xf32>
    %99 = arith.negf %98 : vector<8x256xf32>
    %100 = math.exp %99 : vector<8x256xf32>
    %cst_33 = arith.constant 1.000000e+00 : f32
    %101 = vector.broadcast %cst_33 : f32 to vector<8x256xf32>
    %102 = arith.addf %101, %100 : vector<8x256xf32>
    %103 = arith.divf %101, %102 : vector<8x256xf32>
    %104 = vector.extract_strided_slice %103 {offsets = [0, 0], sizes = [8, 128], strides = [1, 1]} : vector<8x256xf32> to vector<8x128xf32>
    %105 = vector.extract_strided_slice %103 {offsets = [0, 128], sizes = [8, 128], strides = [1, 1]} : vector<8x256xf32> to vector<8x128xf32>
    %106 = vector.extract_strided_slice %93 {offsets = [0, 256], sizes = [8, 128], strides = [1, 1]} : vector<8x384xf32> to vector<8x128xf32>
    %107 = vector.extract_strided_slice %95 {offsets = [0, 256], sizes = [8, 128], strides = [1, 1]} : vector<8x384xf32> to vector<8x128xf32>
    %108 = arith.addf %107, %6 : vector<8x128xf32>
    %109 = arith.mulf %104, %108 : vector<8x128xf32>
    %110 = arith.addf %106, %109 : vector<8x128xf32>
    %111 = math.tanh %110 : vector<8x128xf32>
    %cst_34 = arith.constant 1.000000e+00 : f32
    %112 = vector.broadcast %cst_34 : f32 to vector<8x128xf32>
    %113 = arith.subf %112, %105 : vector<8x128xf32>
    %114 = arith.mulf %113, %111 : vector<8x128xf32>
    %115 = arith.mulf %105, %88 : vector<8x128xf32>
    %116 = arith.addf %114, %115 : vector<8x128xf32>
    %c3_35 = arith.constant 3 : index
    %c0_36 = arith.constant 0 : index
    %c0_37 = arith.constant 0 : index
    %117 = vector.load %arg4[%c3_35, %c0_36, %c0_37] : memref<8x8x128xf32, #tpu.memory_space<vmem>>, vector<1x8x128xf32>
    %118 = vector.shape_cast %117 : vector<1x8x128xf32> to vector<8x128xf32>
    %119 = vector.shape_cast %116 : vector<8x128xf32> to vector<1x8x128xf32>
    tpu.vector_store %arg4[%c3_35, %c0_36, %c0_37], %119 {strides = array<i32>} : memref<8x8x128xf32, #tpu.memory_space<vmem>>, vector<1x8x128xf32>,
    %c4 = arith.constant 4 : index
    %c0_38 = arith.constant 0 : index
    %c0_39 = arith.constant 0 : index
    %120 = vector.load %arg1[%c4, %c0_38, %c0_39] : memref<8x8x384xf32, #tpu.memory_space<vmem>>, vector<1x8x384xf32>
    %121 = vector.shape_cast %120 : vector<1x8x384xf32> to vector<8x384xf32>
    %122 = arith.truncf %116 : vector<8x128xf32> to vector<8x128xbf16>
    %cst_40 = arith.constant dense<0.000000e+00> : vector<8x384xf32>
    %123 = tpu.matmul %122, %3, %cst_40 {dimension_numbers = #tpu.dot_dimension_numbers<[1], [0], [0], [1], [0, 0, 1, 1], [], []>} : vector<8x128xbf16>, vector<128x384xbf16>, vector<8x384xf32> -> vector<8x384xf32>
    %124 = vector.extract_strided_slice %121 {offsets = [0, 0], sizes = [8, 256], strides = [1, 1]} : vector<8x384xf32> to vector<8x256xf32>
    %125 = vector.extract_strided_slice %123 {offsets = [0, 0], sizes = [8, 256], strides = [1, 1]} : vector<8x384xf32> to vector<8x256xf32>
    %126 = arith.addf %124, %125 : vector<8x256xf32>
    %127 = arith.negf %126 : vector<8x256xf32>
    %128 = math.exp %127 : vector<8x256xf32>
    %cst_41 = arith.constant 1.000000e+00 : f32
    %129 = vector.broadcast %cst_41 : f32 to vector<8x256xf32>
    %130 = arith.addf %129, %128 : vector<8x256xf32>
    %131 = arith.divf %129, %130 : vector<8x256xf32>
    %132 = vector.extract_strided_slice %131 {offsets = [0, 0], sizes = [8, 128], strides = [1, 1]} : vector<8x256xf32> to vector<8x128xf32>
    %133 = vector.extract_strided_slice %131 {offsets = [0, 128], sizes = [8, 128], strides = [1, 1]} : vector<8x256xf32> to vector<8x128xf32>
    %134 = vector.extract_strided_slice %121 {offsets = [0, 256], sizes = [8, 128], strides = [1, 1]} : vector<8x384xf32> to vector<8x128xf32>
    %135 = vector.extract_strided_slice %123 {offsets = [0, 256], sizes = [8, 128], strides = [1, 1]} : vector<8x384xf32> to vector<8x128xf32>
    %136 = arith.addf %135, %6 : vector<8x128xf32>
    %137 = arith.mulf %132, %136 : vector<8x128xf32>
    %138 = arith.addf %134, %137 : vector<8x128xf32>
    %139 = math.tanh %138 : vector<8x128xf32>
    %cst_42 = arith.constant 1.000000e+00 : f32
    %140 = vector.broadcast %cst_42 : f32 to vector<8x128xf32>
    %141 = arith.subf %140, %133 : vector<8x128xf32>
    %142 = arith.mulf %141, %139 : vector<8x128xf32>
    %143 = arith.mulf %133, %116 : vector<8x128xf32>
    %144 = arith.addf %142, %143 : vector<8x128xf32>
    %c4_43 = arith.constant 4 : index
    %c0_44 = arith.constant 0 : index
    %c0_45 = arith.constant 0 : index
    %145 = vector.load %arg4[%c4_43, %c0_44, %c0_45] : memref<8x8x128xf32, #tpu.memory_space<vmem>>, vector<1x8x128xf32>
    %146 = vector.shape_cast %145 : vector<1x8x128xf32> to vector<8x128xf32>
    %147 = vector.shape_cast %144 : vector<8x128xf32> to vector<1x8x128xf32>
    tpu.vector_store %arg4[%c4_43, %c0_44, %c0_45], %147 {strides = array<i32>} : memref<8x8x128xf32, #tpu.memory_space<vmem>>, vector<1x8x128xf32>,
    %c5 = arith.constant 5 : index
    %c0_46 = arith.constant 0 : index
    %c0_47 = arith.constant 0 : index
    %148 = vector.load %arg1[%c5, %c0_46, %c0_47] : memref<8x8x384xf32, #tpu.memory_space<vmem>>, vector<1x8x384xf32>
    %149 = vector.shape_cast %148 : vector<1x8x384xf32> to vector<8x384xf32>
    %150 = arith.truncf %144 : vector<8x128xf32> to vector<8x128xbf16>
    %cst_48 = arith.constant dense<0.000000e+00> : vector<8x384xf32>
    %151 = tpu.matmul %150, %3, %cst_48 {dimension_numbers = #tpu.dot_dimension_numbers<[1], [0], [0], [1], [0, 0, 1, 1], [], []>} : vector<8x128xbf16>, vector<128x384xbf16>, vector<8x384xf32> -> vector<8x384xf32>
    %152 = vector.extract_strided_slice %149 {offsets = [0, 0], sizes = [8, 256], strides = [1, 1]} : vector<8x384xf32> to vector<8x256xf32>
    %153 = vector.extract_strided_slice %151 {offsets = [0, 0], sizes = [8, 256], strides = [1, 1]} : vector<8x384xf32> to vector<8x256xf32>
    %154 = arith.addf %152, %153 : vector<8x256xf32>
    %155 = arith.negf %154 : vector<8x256xf32>
    %156 = math.exp %155 : vector<8x256xf32>
    %cst_49 = arith.constant 1.000000e+00 : f32
    %157 = vector.broadcast %cst_49 : f32 to vector<8x256xf32>
    %158 = arith.addf %157, %156 : vector<8x256xf32>
    %159 = arith.divf %157, %158 : vector<8x256xf32>
    %160 = vector.extract_strided_slice %159 {offsets = [0, 0], sizes = [8, 128], strides = [1, 1]} : vector<8x256xf32> to vector<8x128xf32>
    %161 = vector.extract_strided_slice %159 {offsets = [0, 128], sizes = [8, 128], strides = [1, 1]} : vector<8x256xf32> to vector<8x128xf32>
    %162 = vector.extract_strided_slice %149 {offsets = [0, 256], sizes = [8, 128], strides = [1, 1]} : vector<8x384xf32> to vector<8x128xf32>
    %163 = vector.extract_strided_slice %151 {offsets = [0, 256], sizes = [8, 128], strides = [1, 1]} : vector<8x384xf32> to vector<8x128xf32>
    %164 = arith.addf %163, %6 : vector<8x128xf32>
    %165 = arith.mulf %160, %164 : vector<8x128xf32>
    %166 = arith.addf %162, %165 : vector<8x128xf32>
    %167 = math.tanh %166 : vector<8x128xf32>
    %cst_50 = arith.constant 1.000000e+00 : f32
    %168 = vector.broadcast %cst_50 : f32 to vector<8x128xf32>
    %169 = arith.subf %168, %161 : vector<8x128xf32>
    %170 = arith.mulf %169, %167 : vector<8x128xf32>
    %171 = arith.mulf %161, %144 : vector<8x128xf32>
    %172 = arith.addf %170, %171 : vector<8x128xf32>
    %c5_51 = arith.constant 5 : index
    %c0_52 = arith.constant 0 : index
    %c0_53 = arith.constant 0 : index
    %173 = vector.load %arg4[%c5_51, %c0_52, %c0_53] : memref<8x8x128xf32, #tpu.memory_space<vmem>>, vector<1x8x128xf32>
    %174 = vector.shape_cast %173 : vector<1x8x128xf32> to vector<8x128xf32>
    %175 = vector.shape_cast %172 : vector<8x128xf32> to vector<1x8x128xf32>
    tpu.vector_store %arg4[%c5_51, %c0_52, %c0_53], %175 {strides = array<i32>} : memref<8x8x128xf32, #tpu.memory_space<vmem>>, vector<1x8x128xf32>,
    %c6 = arith.constant 6 : index
    %c0_54 = arith.constant 0 : index
    %c0_55 = arith.constant 0 : index
    %176 = vector.load %arg1[%c6, %c0_54, %c0_55] : memref<8x8x384xf32, #tpu.memory_space<vmem>>, vector<1x8x384xf32>
    %177 = vector.shape_cast %176 : vector<1x8x384xf32> to vector<8x384xf32>
    %178 = arith.truncf %172 : vector<8x128xf32> to vector<8x128xbf16>
    %cst_56 = arith.constant dense<0.000000e+00> : vector<8x384xf32>
    %179 = tpu.matmul %178, %3, %cst_56 {dimension_numbers = #tpu.dot_dimension_numbers<[1], [0], [0], [1], [0, 0, 1, 1], [], []>} : vector<8x128xbf16>, vector<128x384xbf16>, vector<8x384xf32> -> vector<8x384xf32>
    %180 = vector.extract_strided_slice %177 {offsets = [0, 0], sizes = [8, 256], strides = [1, 1]} : vector<8x384xf32> to vector<8x256xf32>
    %181 = vector.extract_strided_slice %179 {offsets = [0, 0], sizes = [8, 256], strides = [1, 1]} : vector<8x384xf32> to vector<8x256xf32>
    %182 = arith.addf %180, %181 : vector<8x256xf32>
    %183 = arith.negf %182 : vector<8x256xf32>
    %184 = math.exp %183 : vector<8x256xf32>
    %cst_57 = arith.constant 1.000000e+00 : f32
    %185 = vector.broadcast %cst_57 : f32 to vector<8x256xf32>
    %186 = arith.addf %185, %184 : vector<8x256xf32>
    %187 = arith.divf %185, %186 : vector<8x256xf32>
    %188 = vector.extract_strided_slice %187 {offsets = [0, 0], sizes = [8, 128], strides = [1, 1]} : vector<8x256xf32> to vector<8x128xf32>
    %189 = vector.extract_strided_slice %187 {offsets = [0, 128], sizes = [8, 128], strides = [1, 1]} : vector<8x256xf32> to vector<8x128xf32>
    %190 = vector.extract_strided_slice %177 {offsets = [0, 256], sizes = [8, 128], strides = [1, 1]} : vector<8x384xf32> to vector<8x128xf32>
    %191 = vector.extract_strided_slice %179 {offsets = [0, 256], sizes = [8, 128], strides = [1, 1]} : vector<8x384xf32> to vector<8x128xf32>
    %192 = arith.addf %191, %6 : vector<8x128xf32>
    %193 = arith.mulf %188, %192 : vector<8x128xf32>
    %194 = arith.addf %190, %193 : vector<8x128xf32>
    %195 = math.tanh %194 : vector<8x128xf32>
    %cst_58 = arith.constant 1.000000e+00 : f32
    %196 = vector.broadcast %cst_58 : f32 to vector<8x128xf32>
    %197 = arith.subf %196, %189 : vector<8x128xf32>
    %198 = arith.mulf %197, %195 : vector<8x128xf32>
    %199 = arith.mulf %189, %172 : vector<8x128xf32>
    %200 = arith.addf %198, %199 : vector<8x128xf32>
    %c6_59 = arith.constant 6 : index
    %c0_60 = arith.constant 0 : index
    %c0_61 = arith.constant 0 : index
    %201 = vector.load %arg4[%c6_59, %c0_60, %c0_61] : memref<8x8x128xf32, #tpu.memory_space<vmem>>, vector<1x8x128xf32>
    %202 = vector.shape_cast %201 : vector<1x8x128xf32> to vector<8x128xf32>
    %203 = vector.shape_cast %200 : vector<8x128xf32> to vector<1x8x128xf32>
    tpu.vector_store %arg4[%c6_59, %c0_60, %c0_61], %203 {strides = array<i32>} : memref<8x8x128xf32, #tpu.memory_space<vmem>>, vector<1x8x128xf32>,
    %c7 = arith.constant 7 : index
    %c0_62 = arith.constant 0 : index
    %c0_63 = arith.constant 0 : index
    %204 = vector.load %arg1[%c7, %c0_62, %c0_63] : memref<8x8x384xf32, #tpu.memory_space<vmem>>, vector<1x8x384xf32>
    %205 = vector.shape_cast %204 : vector<1x8x384xf32> to vector<8x384xf32>
    %206 = arith.truncf %200 : vector<8x128xf32> to vector<8x128xbf16>
    %cst_64 = arith.constant dense<0.000000e+00> : vector<8x384xf32>
    %207 = tpu.matmul %206, %3, %cst_64 {dimension_numbers = #tpu.dot_dimension_numbers<[1], [0], [0], [1], [0, 0, 1, 1], [], []>} : vector<8x128xbf16>, vector<128x384xbf16>, vector<8x384xf32> -> vector<8x384xf32>
    %208 = vector.extract_strided_slice %205 {offsets = [0, 0], sizes = [8, 256], strides = [1, 1]} : vector<8x384xf32> to vector<8x256xf32>
    %209 = vector.extract_strided_slice %207 {offsets = [0, 0], sizes = [8, 256], strides = [1, 1]} : vector<8x384xf32> to vector<8x256xf32>
    %210 = arith.addf %208, %209 : vector<8x256xf32>
    %211 = arith.negf %210 : vector<8x256xf32>
    %212 = math.exp %211 : vector<8x256xf32>
    %cst_65 = arith.constant 1.000000e+00 : f32
    %213 = vector.broadcast %cst_65 : f32 to vector<8x256xf32>
    %214 = arith.addf %213, %212 : vector<8x256xf32>
    %215 = arith.divf %213, %214 : vector<8x256xf32>
    %216 = vector.extract_strided_slice %215 {offsets = [0, 0], sizes = [8, 128], strides = [1, 1]} : vector<8x256xf32> to vector<8x128xf32>
    %217 = vector.extract_strided_slice %215 {offsets = [0, 128], sizes = [8, 128], strides = [1, 1]} : vector<8x256xf32> to vector<8x128xf32>
    %218 = vector.extract_strided_slice %205 {offsets = [0, 256], sizes = [8, 128], strides = [1, 1]} : vector<8x384xf32> to vector<8x128xf32>
    %219 = vector.extract_strided_slice %207 {offsets = [0, 256], sizes = [8, 128], strides = [1, 1]} : vector<8x384xf32> to vector<8x128xf32>
    %220 = arith.addf %219, %6 : vector<8x128xf32>
    %221 = arith.mulf %216, %220 : vector<8x128xf32>
    %222 = arith.addf %218, %221 : vector<8x128xf32>
    %223 = math.tanh %222 : vector<8x128xf32>
    %cst_66 = arith.constant 1.000000e+00 : f32
    %224 = vector.broadcast %cst_66 : f32 to vector<8x128xf32>
    %225 = arith.subf %224, %217 : vector<8x128xf32>
    %226 = arith.mulf %225, %223 : vector<8x128xf32>
    %227 = arith.mulf %217, %200 : vector<8x128xf32>
    %228 = arith.addf %226, %227 : vector<8x128xf32>
    %c7_67 = arith.constant 7 : index
    %c0_68 = arith.constant 0 : index
    %c0_69 = arith.constant 0 : index
    %229 = vector.load %arg4[%c7_67, %c0_68, %c0_69] : memref<8x8x128xf32, #tpu.memory_space<vmem>>, vector<1x8x128xf32>
    %230 = vector.shape_cast %229 : vector<1x8x128xf32> to vector<8x128xf32>
    %231 = vector.shape_cast %228 : vector<8x128xf32> to vector<1x8x128xf32>
    tpu.vector_store %arg4[%c7_67, %c0_68, %c0_69], %231 {strides = array<i32>} : memref<8x8x128xf32, #tpu.memory_space<vmem>>, vector<1x8x128xf32>,
    %c0_70 = arith.constant 0 : index
    %c0_71 = arith.constant 0 : index
    %232 = vector.load %arg5[%c0_70, %c0_71] : memref<8x128xf32, #tpu.memory_space<vmem>>, vector<8x128xf32>
    tpu.vector_store %arg5[%c0_70, %c0_71], %228 {strides = array<i32>} : memref<8x128xf32, #tpu.memory_space<vmem>>, vector<8x128xf32>,
    return
  }
  func.func @transform_0(%arg0: i32) -> (i32, i32, i32) {
    %c0_i32 = arith.constant 0 : i32
    %c0_i32_0 = arith.constant 0 : i32
    %c0_i32_1 = arith.constant 0 : i32
    return %arg0, %c0_i32, %c0_i32_0 : i32, i32, i32
  }
  func.func @transform_1(%arg0: i32) -> (i32, i32) {
    %c0_i32 = arith.constant 0 : i32
    %c0_i32_0 = arith.constant 0 : i32
    %c0_i32_1 = arith.constant 0 : i32
    return %c0_i32, %c0_i32_0 : i32, i32
  }
  func.func @transform_2(%arg0: i32) -> (i32, i32) {
    %c0_i32 = arith.constant 0 : i32
    %c0_i32_0 = arith.constant 0 : i32
    %c0_i32_1 = arith.constant 0 : i32
    return %c0_i32, %c0_i32_0 : i32, i32
  }
  func.func @transform_3(%arg0: i32) -> (i32, i32, i32) {
    %c0_i32 = arith.constant 0 : i32
    %c0_i32_0 = arith.constant 0 : i32
    %c0_i32_1 = arith.constant 0 : i32
    return %arg0, %c0_i32, %c0_i32_0 : i32, i32, i32
  }
}

</mosaic_0001>

<bundles_post_ra>
// kernel: noisegen_forward.4
= control target key start
LH: loop header
LB: loop body
LE: loop exit
PB: predicated region body
PF: predicated region fallthrough
CT: control target
= control target key end

     0   :  { %v276_v1 = vmov 0   ;;  %vm64_vm0 = vcmask 130048   ;;  %v33_v16 = vlaneseq  ;;  %s433_s1 = inlined_call_operand.vmem [shape: bf16[16,384], index: 1, kind: input, shape index: {}]   ;;  %s434_s0 = inlined_call_operand.vmem [shape: f32[64,16], index: 0, kind: input, shape index: {}]   ;;  %s435_s2 = inlined_call_operand.vmem [shape: f32[1,384], index: 2, kind: input, shape index: {}]   ;;  %s436_s3 = inlined_call_operand.vmem [shape: f32[64,384], index: 3, kind: output, shape index: {}]  }
   0x1   :  { %v272_v0 = vld [vmem:[%s433_s1 + $0x4] ss:$12 sps:$4 sm:$0xff]   ;;  %109 = vmatprep.mubr.bf16.mxu0 %v276_v1  ;;  %139 = vmatprep.mubr.bf16.mxu1 %v276_v1  ;;  %v274_v2 = vld [vmem:[%s433_s1] ss:$12 sps:$4 sm:$0xff]   ;;  %v22_v7 = vld [vmem:[%s434_s0 + $0x38] sm:$0xff] }
   0x2   :  { %v15_v3 = vld [vmem:[%s434_s0] sm:$0xff]  ;;  %v16_v4 = vld [vmem:[%s434_s0 + $0x8] sm:$0xff]  ;;  %77 = vmatprep.subr.bf16.mxu0 %v272_v0  ;;  %269 = vmatprep.subr.bf16.mxu1 %v272_v0  ;;  %v21_v6 = vld [vmem:[%s434_s0 + $0x30] sm:$0xff]  ;;  %v34_v17 = vshrl.u32 %v33_v16, 7 }
   0x3   :  { %v23_v5 = vpack.c.bf16 %v16_v4, %v15_v3  ;;  %78 = vmatpush1.bf16.msra.mxu0 %v274_v2  ;;  %270 = vmatpush1.bf16.msra.mxu1 %v274_v2  ;;  %v26_v8 = vpack.c.bf16 %v22_v7, %v21_v6  ;;  %v275_v9 = vld [vmem:[%s433_s1 + $0x8] ss:$12 sps:$4 sm:$0xff]   ;;  %v18_v11 = vld [vmem:[%s434_s0 + $0x18] sm:$0xff]  ;;  %v19_v12 = vld [vmem:[%s434_s0 + $0x20] sm:$0xff] }
   0x4   :  { %259 = vmatprep.subr.bf16.mxu1 %v275_v9  ;;  %v17_v10 = vld [vmem:[%s434_s0 + $0x10] sm:$0xff]  ;;  %v20_v13 = vld [vmem:[%s434_s0 + $0x28] sm:$0xff]  ;;  %v35_v18 = vsub.s32 0, %v34_v17  ;;  %v31_v19 = vld [vmem:[%s435_s2] sm:$0x7]  ;;  %v39_v20 = vsub.s32 1, %v34_v17 }
   0x5   :  { %v24_v14 = vpack.c.bf16 %v18_v11, %v17_v10  ;;  %v25_v15 = vpack.c.bf16 %v20_v13, %v19_v12  ;;  %v43_v29 = vsub.s32 2, %v34_v17 }
   0x6   :  { %246 = vmatmul.mubr.msk.bf16.vlgmr.msra.gmra.mrb[0].mxu0 %vm64_vm0, %v23_v5  ;;  %249 = vmatmul.mubr.msk.bf16.vlgmr.msra.gmra.mrb[0].mxu1 %vm64_vm0, %v26_v8  ;;  %v341_v21 = vrot.slane %v31_v19, %v35_v18  ;;  %v343_v22 = vrot.slane %v31_v19, %v39_v20 }
   0x7   :  { %260 = vmatpush3.bf16.msra.mxu1 %v275_v9  ;;  %119 = vmatprep.mubr.bf16.mxu0 %v276_v1  ;;  %v44_v40 = vrot.slane %v31_v19, %v43_v29 }
   0x8   :  { %261 = vmatprep.mubr.msk.bf16.mxu1 %vm64_vm0, %v23_v5 }
   0xe   :  { %247 = vmatmul.mubr.msk.bf16.gmra.mrb[4].mxu0 %vm64_vm0, %v24_v14  ;;  %262 = vmatmul.mubr.msk.bf16.vlgmr.msra.gmra.mrb[4].mxu1 %vm64_vm0, %v24_v14 }
   0xf   :  { %129 = vmatprep.mubr.bf16.mxu0 %v276_v1  ;;  %265 = vmatprep.mubr.msk.bf16.mxu1 %vm64_vm0, %v25_v15 }
  0x16   :  { %248 = vmatmul.mubr.msk.bf16.gmra.mrb[8].mxu0 %vm64_vm0, %v25_v15  ;;  %266 = vmatmul.mubr.msk.bf16.gmra.mrb[8].mxu1 %vm64_vm0, %v26_v8 }
  0xd9   :  { %v111_v23 = vpop.f32.mrb[0].mxu0  ;;  %v141_v24 = vpop.f32.mrb[0].mxu1 }
  0xda   :  { %v112_v25 = vadd.f32 %v111_v23, %v341_v21  ;;  %v142_v26 = vadd.f32 %v141_v24, %v341_v21  ;;  %v113_v27 = vpop.f32.mrb[1].mxu0  ;;  %v143_v28 = vpop.f32.mrb[1].mxu1 }
  0xdb   :  { %v114_v30 = vadd.f32 %v113_v27, %v343_v22  ;;  %v144_v31 = vadd.f32 %v143_v28, %v343_v22  ;;  %v115_v32 = vpop.f32.mrb[2].mxu0  ;;  %v145_v33 = vpop.f32.mrb[2].mxu1 }
  0xdc   :  { %215 = vst [vmem:[%s436_s3] sm:$0xff] %v112_v25  ;;  %233 = vst [vmem:[%s436_s3 + $0x90] sm:$0xff] %v142_v26  ;;  %v116_v34 = vadd.f32 %v115_v32, %v341_v21  ;;  %v146_v35 = vadd.f32 %v145_v33, %v341_v21  ;;  %v117_v36 = vpop.f32.mrb[3].mxu0  ;;  %v147_v37 = vpop.f32.mrb[3].mxu1 }
  0xdd   :  { %216 = vst [vmem:[%s436_s3 + $0x8] sm:$0xff] %v114_v30  ;;  %234 = vst [vmem:[%s436_s3 + $0x98] sm:$0xff] %v144_v31  ;;  %v118_v38 = vadd.f32 %v117_v36, %v343_v22  ;;  %v148_v39 = vadd.f32 %v147_v37, %v343_v22 }
  0xde   :  { %218 = vst [vmem:[%s436_s3 + $0x18] sm:$0xff] %v116_v34  ;;  %236 = vst [vmem:[%s436_s3 + $0xa8] sm:$0xff] %v146_v35 }
  0xdf   :  { %219 = vst [vmem:[%s436_s3 + $0x20] sm:$0xff] %v118_v38  ;;  %237 = vst [vmem:[%s436_s3 + $0xb0] sm:$0xff] %v148_v39 }
  0xe1   :  { %v121_v41 = vpop.f32.mrb[4].mxu0  ;;  %v263_v42 = vpop.f32.mrb[4].mxu1 }
  0xe2   :  { %v122_v43 = vadd.f32 %v121_v41, %v341_v21  ;;  %v193_v44 = vadd.f32 %v263_v42, %v44_v40  ;;  %v123_v45 = vpop.f32.mrb[5].mxu0  ;;  %v184_v46 = vpop.f32.mrb[5].mxu1 }
  0xe3   :  { %v124_v47 = vadd.f32 %v123_v45, %v343_v22  ;;  %v185_v48 = vadd.f32 %v184_v46, %v44_v40  ;;  %v125_v49 = vpop.f32.mrb[6].mxu0  ;;  %v264_v50 = vpop.f32.mrb[6].mxu1 }
  0xe4   :  { %221 = vst [vmem:[%s436_s3 + $0x30] sm:$0xff] %v122_v43  ;;  %223 = vst [vmem:[%s436_s3 + $0x40] sm:$0xff] %v193_v44  ;;  %v126_v51 = vadd.f32 %v125_v49, %v341_v21  ;;  %v196_v52 = vadd.f32 %v264_v50, %v44_v40  ;;  %v127_v53 = vpop.f32.mrb[7].mxu0  ;;  %v187_v54 = vpop.f32.mrb[7].mxu1 }
  0xe5   :  { %222 = vst [vmem:[%s436_s3 + $0x38] sm:$0xff] %v124_v47  ;;  %217 = vst [vmem:[%s436_s3 + $0x10] sm:$0xff] %v185_v48  ;;  %v128_v55 = vadd.f32 %v127_v53, %v343_v22  ;;  %v188_v56 = vadd.f32 %v187_v54, %v44_v40 }
  0xe6   :  { %224 = vst [vmem:[%s436_s3 + $0x48] sm:$0xff] %v126_v51  ;;  %226 = vst [vmem:[%s436_s3 + $0x58] sm:$0xff] %v196_v52 }
  0xe7   :  { %225 = vst [vmem:[%s436_s3 + $0x50] sm:$0xff] %v128_v55  ;;  %220 = vst [vmem:[%s436_s3 + $0x28] sm:$0xff] %v188_v56 }
  0xe9   :  { %v131_v57 = vpop.f32.mrb[8].mxu0  ;;  %v267_v58 = vpop.f32.mrb[8].mxu1 }
  0xea   :  { %v132_v59 = vadd.f32 %v131_v57, %v341_v21  ;;  %v209_v60 = vadd.f32 %v267_v58, %v44_v40  ;;  %v133_v61 = vpop.f32.mrb[9].mxu0  ;;  %v200_v62 = vpop.f32.mrb[9].mxu1 }
  0xeb   :  { %v134_v63 = vadd.f32 %v133_v61, %v343_v22  ;;  %v201_v0 = vadd.f32 %v200_v62, %v44_v40  ;;  %v135_v1 = vpop.f32.mrb[10].mxu0  ;;  %v268_v2 = vpop.f32.mrb[10].mxu1 }
  0xec   :  { %227 = vst [vmem:[%s436_s3 + $0x60] sm:$0xff] %v132_v59  ;;  %235 = vst [vmem:[%s436_s3 + $0xa0] sm:$0xff] %v209_v60  ;;  %v136_v3 = vadd.f32 %v135_v1, %v341_v21  ;;  %v212_v4 = vadd.f32 %v268_v2, %v44_v40  ;;  %v137_v5 = vpop.f32.mrb[11].mxu0  ;;  %v203_v6 = vpop.f32.mrb[11].mxu1 }
  0xed   :  { %228 = vst [vmem:[%s436_s3 + $0x68] sm:$0xff] %v134_v63  ;;  %229 = vst [vmem:[%s436_s3 + $0x70] sm:$0xff] %v201_v0  ;;  %v138_v7 = vadd.f32 %v137_v5, %v343_v22  ;;  %v204_v8 = vadd.f32 %v203_v6, %v44_v40 }
  0xee   :  { %230 = vst [vmem:[%s436_s3 + $0x78] sm:$0xff] %v136_v3  ;;  %238 = vst [vmem:[%s436_s3 + $0xb8] sm:$0xff] %v212_v4 }
  0xef   :  { %231 = vst [vmem:[%s436_s3 + $0x80] sm:$0xff] %v138_v7  ;;  %232 = vst [vmem:[%s436_s3 + $0x88] sm:$0xff] %v204_v8 }

// kernel: noisegen_forward.6
= control target key start
LH: loop header
LB: loop body
LE: loop exit
PB: predicated region body
PF: predicated region fallthrough
CT: control target
= control target key end

     0   :  { %v463_v1 = vmov 0   ;;  %v61_v37 = vlaneseq  ;;  %s679_s1 = inlined_call_operand.vmem [shape: bf16[128,384], index: 1, kind: input, shape index: {}]   ;;  %s680_s0 = inlined_call_operand.vmem [shape: f32[64,128], index: 0, kind: input, shape index: {}]   ;;  %s681_s2 = inlined_call_operand.vmem [shape: f32[1,384], index: 2, kind: input, shape index: {}]   ;;  %s682_s3 = inlined_call_operand.vmem [shape: f32[64,384], index: 3, kind: output, shape index: {}]  }
   0x1   :  { %v431_v0 = vld [vmem:[%s679_s1 + $0x4] ss:$12 sps:$4 sm:$0xff]   ;;  %236 = vmatprep.mubr.bf16.mxu0 %v463_v1  ;;  %v433_v2 = vld [vmem:[%s679_s1] ss:$12 sps:$4 sm:$0xff]   ;;  %v434_v3 = vld [vmem:[%s679_s1 + $0x1c] ss:$12 sps:$4 sm:$0xff]  }
   0x2   :  { %204 = vmatprep.subr.bf16.mxu0 %v431_v0  ;;  %v436_v4 = vld [vmem:[%s679_s1 + $0x18] ss:$12 sps:$4 sm:$0xff]   ;;  %v437_v5 = vld [vmem:[%s679_s1 + $0x34] ss:$12 sps:$4 sm:$0xff]   ;;  %v439_v7 = vld [vmem:[%s679_s1 + $0x30] ss:$12 sps:$4 sm:$0xff]  }
   0x3   :  { %205 = vmatpush1.bf16.msra.mxu0 %v433_v2  ;;  %v443_v6 = vld [vmem:[%s679_s1 + $0x8] ss:$12 sps:$4 sm:$0xff]   ;;  %v440_v8 = vld [vmem:[%s679_s1 + $0x4c] ss:$12 sps:$4 sm:$0xff]   ;;  %v444_v12 = vld [vmem:[%s679_s1 + $0x64] ss:$12 sps:$4 sm:$0xff]  }
   0x4   :  { %206 = vmatprep.subr.bf16.mxu0 %v434_v3  ;;  %406 = vmatprep.subr.bf16.mxu1 %v443_v6  ;;  %v447_v9 = vld [vmem:[%s679_s1 + $0x20] ss:$12 sps:$4 sm:$0xff]   ;;  %v451_v10 = vld [vmem:[%s679_s1 + $0x38] ss:$12 sps:$4 sm:$0xff]   ;;  %v442_v11 = vld [vmem:[%s679_s1 + $0x48] ss:$12 sps:$4 sm:$0xff]  }
   0x5   :  { %407 = vmatpush3.bf16.msra.mxu1 %v443_v6  ;;  %v446_v13 = vld [vmem:[%s679_s1 + $0x60] ss:$12 sps:$4 sm:$0xff]   ;;  %v455_v14 = vld [vmem:[%s679_s1 + $0x50] ss:$12 sps:$4 sm:$0xff]   ;;  %v459_v19 = vld [vmem:[%s679_s1 + $0x68] ss:$12 sps:$4 sm:$0xff]  }
   0x6   :  { %408 = vmatprep.subr.bf16.mxu1 %v447_v9  ;;  %v448_v15 = vld [vmem:[%s679_s1 + $0x7c] ss:$12 sps:$4 sm:$0xff]   ;;  %v15_v16 = vld [vmem:[%s680_s0] sm:$0xff]  ;;  %v456_v24 = vld [vmem:[%s679_s1 + $0xac] ss:$12 sps:$4 sm:$0xff]   ;;  %v62_v38 = vshrl.u32 %v61_v37, 7 }
   0x7   :  { %207 = vmatpush1.bf16.msra.mxu0 %v436_v4  ;;  %v16_v17 = vld [vmem:[%s680_s0 + $0x8] sm:$0xff]  ;;  %v450_v20 = vld [vmem:[%s679_s1 + $0x78] ss:$12 sps:$4 sm:$0xff]   ;;  %v452_v21 = vld [vmem:[%s679_s1 + $0x94] ss:$12 sps:$4 sm:$0xff]  }
   0x8   :  { %208 = vmatprep.subr.bf16.mxu0 %v437_v5  ;;  %v23_v18 = vpack.c.bf16 %v16_v17, %v15_v16  ;;  %v460_v22 = vld [vmem:[%s679_s1 + $0x80] ss:$12 sps:$4 sm:$0xff]   ;;  %v454_v23 = vld [vmem:[%s679_s1 + $0x90] ss:$12 sps:$4 sm:$0xff]   ;;  %v461_v25 = vld [vmem:[%s679_s1 + $0x98] ss:$12 sps:$4 sm:$0xff]  }
   0x9   :  { %409 = vmatpush3.bf16.msra.mxu1 %v447_v9  ;;  %v458_v26 = vld [vmem:[%s679_s1 + $0xa8] ss:$12 sps:$4 sm:$0xff]   ;;  %v462_v27 = vld [vmem:[%s679_s1 + $0xb0] ss:$12 sps:$4 sm:$0xff]   ;;  %v19_v30 = vld [vmem:[%s680_s0 + $0x20] sm:$0xff]  ;;  %v63_v39 = vsub.s32 0, %v62_v38 }
   0xa   :  { %410 = vmatprep.subr.bf16.mxu1 %v451_v10  ;;  %422 = vmatprep.mubr.bf16.mxu1 %v23_v18  ;;  %v17_v28 = vld [vmem:[%s680_s0 + $0x10] sm:$0xff]  ;;  %v18_v29 = vld [vmem:[%s680_s0 + $0x18] sm:$0xff]  ;;  %v20_v31 = vld [vmem:[%s680_s0 + $0x28] sm:$0xff]  ;;  %v67_v41 = vsub.s32 1, %v62_v38  ;;  %v71_v44 = vsub.s32 2, %v62_v38 }
   0xb   :  { %209 = vmatpush1.bf16.msra.mxu0 %v439_v7  ;;  %v24_v32 = vpack.c.bf16 %v18_v29, %v17_v28  ;;  %v25_v33 = vpack.c.bf16 %v20_v31, %v19_v30  ;;  %v21_v34 = vld [vmem:[%s680_s0 + $0x30] sm:$0xff]  ;;  %v22_v35 = vld [vmem:[%s680_s0 + $0x38] sm:$0xff]  ;;  %v59_v40 = vld [vmem:[%s681_s2] sm:$0x7] }
   0xc   :  { %210 = vmatprep.subr.bf16.mxu0 %v440_v8  ;;  %v26_v36 = vpack.c.bf16 %v22_v35, %v21_v34  ;;  %v587_v42 = vrot.slane %v59_v40, %v63_v39  ;;  %v589_v43 = vrot.slane %v59_v40, %v67_v41  ;;  %v72_v52 = vrot.slane %v59_v40, %v71_v44 }
   0xd   :  { %411 = vmatpush3.bf16.msra.mxu1 %v451_v10 }
   0xe   :  { %412 = vmatprep.subr.bf16.mxu1 %v455_v14 }
   0xf   :  { %211 = vmatpush1.bf16.msra.mxu0 %v442_v11 }
  0x10   :  { %212 = vmatprep.subr.bf16.mxu0 %v444_v12 }
  0x11   :  { %413 = vmatpush3.bf16.msra.mxu1 %v455_v14 }
  0x12   :  { %414 = vmatprep.subr.bf16.mxu1 %v459_v19 }
  0x13   :  { %213 = vmatpush1.bf16.msra.mxu0 %v446_v13 }
  0x14   :  { %214 = vmatprep.subr.bf16.mxu0 %v448_v15 }
  0x15   :  { %415 = vmatpush3.bf16.msra.mxu1 %v459_v19 }
  0x16   :  { %416 = vmatprep.subr.bf16.mxu1 %v460_v22 }
  0x17   :  { %215 = vmatpush1.bf16.msra.mxu0 %v450_v20 }
  0x18   :  { %216 = vmatprep.subr.bf16.mxu0 %v452_v21 }
  0x19   :  { %417 = vmatpush3.bf16.msra.mxu1 %v460_v22 }
  0x1a   :  { %418 = vmatprep.subr.bf16.mxu1 %v461_v25 }
  0x1b   :  { %217 = vmatpush1.bf16.msra.mxu0 %v454_v23 }
  0x1c   :  { %218 = vmatprep.subr.bf16.mxu0 %v456_v24 }
  0x1d   :  { %419 = vmatpush3.bf16.msra.mxu1 %v461_v25 }
  0x1e   :  { %420 = vmatprep.subr.bf16.mxu1 %v462_v27 }
  0x1f   :  { %219 = vmatpush1.bf16.msra.mxu0 %v458_v26 }
  0x21   :  { %421 = vmatpush3.bf16.msra.mxu1 %v462_v27 }
  0x22   :  { %237 = vmatmul.mubr.bf16.vlgmr.msra.gmra.mrb[0].mxu0 %v23_v18 }
  0x23   :  { %246 = vmatprep.mubr.bf16.mxu0 %v463_v1 }
  0x24   :  { %423 = vmatmul.mubr.bf16.vlgmr.msra.gmra.mrb[0].mxu1 %v24_v32 }
  0x25   :  { %426 = vmatprep.mubr.bf16.mxu1 %v25_v33 }
  0x2a   :  { %247 = vmatmul.mubr.bf16.gmra.mrb[4].mxu0 %v24_v32 }
  0x2b   :  { %256 = vmatprep.mubr.bf16.mxu0 %v463_v1 }
  0x2c   :  { %427 = vmatmul.mubr.bf16.gmra.mrb[4].mxu1 %v26_v36 }
  0x32   :  { %257 = vmatmul.mubr.bf16.gmra.mrb[8].mxu0 %v25_v33 }
  0x33   :  { %266 = vmatprep.mubr.bf16.mxu0 %v463_v1 }
  0x3a   :  { %267 = vmatmul.mubr.bf16.gmra.mrb[12].mxu0 %v26_v36 }
  0xf5   :  { %v238_v45 = vpop.f32.mrb[0].mxu0 }
  0xf6   :  { %v239_v46 = vadd.f32 %v238_v45, %v587_v42  ;;  %v240_v47 = vpop.f32.mrb[1].mxu0 }
  0xf7   :  { %v241_v48 = vadd.f32 %v240_v47, %v589_v43  ;;  %v242_v49 = vpop.f32.mrb[2].mxu0  ;;  %v424_v54 = vpop.f32.mrb[0].mxu1 }
  0xf8   :  { %342 = vst [vmem:[%s682_s3] sm:$0xff] %v239_v46  ;;  %v243_v50 = vadd.f32 %v242_v49, %v587_v42  ;;  %v244_v51 = vpop.f32.mrb[3].mxu0  ;;  %v320_v55 = vadd.f32 %v424_v54, %v72_v52  ;;  %v311_v56 = vpop.f32.mrb[1].mxu1 }
  0xf9   :  { %343 = vst [vmem:[%s682_s3 + $0x8] sm:$0xff] %v241_v48  ;;  %v245_v53 = vadd.f32 %v244_v51, %v589_v43  ;;  %v312_v58 = vadd.f32 %v311_v56, %v72_v52  ;;  %v425_v59 = vpop.f32.mrb[2].mxu1 }
  0xfa   :  { %345 = vst [vmem:[%s682_s3 + $0x18] sm:$0xff] %v243_v50  ;;  %350 = vst [vmem:[%s682_s3 + $0x40] sm:$0xff] %v320_v55  ;;  %v323_v62 = vadd.f32 %v425_v59, %v72_v52  ;;  %v314_v63 = vpop.f32.mrb[3].mxu1 }
  0xfb   :  { %346 = vst [vmem:[%s682_s3 + $0x20] sm:$0xff] %v245_v53  ;;  %344 = vst [vmem:[%s682_s3 + $0x10] sm:$0xff] %v312_v58  ;;  %v315_v2 = vadd.f32 %v314_v63, %v72_v52 }
  0xfc   :  { %353 = vst [vmem:[%s682_s3 + $0x58] sm:$0xff] %v323_v62 }
  0xfd   :  { %v248_v57 = vpop.f32.mrb[4].mxu0  ;;  %347 = vst [vmem:[%s682_s3 + $0x28] sm:$0xff] %v315_v2 }
  0xfe   :  { %v249_v60 = vadd.f32 %v248_v57, %v587_v42  ;;  %v250_v61 = vpop.f32.mrb[5].mxu0 }
  0xff   :  { %v251_v0 = vadd.f32 %v250_v61, %v589_v43  ;;  %v252_v1 = vpop.f32.mrb[6].mxu0  ;;  %v428_v6 = vpop.f32.mrb[4].mxu1 }
 0x100   :  { %348 = vst [vmem:[%s682_s3 + $0x30] sm:$0xff] %v249_v60  ;;  %v253_v3 = vadd.f32 %v252_v1, %v587_v42  ;;  %v254_v4 = vpop.f32.mrb[7].mxu0  ;;  %v336_v7 = vadd.f32 %v428_v6, %v72_v52  ;;  %v327_v8 = vpop.f32.mrb[5].mxu1 }
 0x101   :  { %349 = vst [vmem:[%s682_s3 + $0x38] sm:$0xff] %v251_v0  ;;  %v255_v5 = vadd.f32 %v254_v4, %v589_v43  ;;  %v328_v10 = vadd.f32 %v327_v8, %v72_v52  ;;  %v429_v11 = vpop.f32.mrb[6].mxu1 }
 0x102   :  { %351 = vst [vmem:[%s682_s3 + $0x48] sm:$0xff] %v253_v3  ;;  %362 = vst [vmem:[%s682_s3 + $0xa0] sm:$0xff] %v336_v7  ;;  %v339_v14 = vadd.f32 %v429_v11, %v72_v52  ;;  %v330_v15 = vpop.f32.mrb[7].mxu1 }
 0x103   :  { %352 = vst [vmem:[%s682_s3 + $0x50] sm:$0xff] %v255_v5  ;;  %356 = vst [vmem:[%s682_s3 + $0x70] sm:$0xff] %v328_v10  ;;  %v331_v18 = vadd.f32 %v330_v15, %v72_v52 }
 0x104   :  { %365 = vst [vmem:[%s682_s3 + $0xb8] sm:$0xff] %v339_v14 }
 0x105   :  { %v258_v9 = vpop.f32.mrb[8].mxu0  ;;  %359 = vst [vmem:[%s682_s3 + $0x88] sm:$0xff] %v331_v18 }
 0x106   :  { %v259_v12 = vadd.f32 %v258_v9, %v587_v42  ;;  %v260_v13 = vpop.f32.mrb[9].mxu0 }
 0x107   :  { %v261_v16 = vadd.f32 %v260_v13, %v589_v43  ;;  %v262_v17 = vpop.f32.mrb[10].mxu0 }
 0x108   :  { %354 = vst [vmem:[%s682_s3 + $0x60] sm:$0xff] %v259_v12  ;;  %v263_v19 = vadd.f32 %v262_v17, %v587_v42  ;;  %v264_v20 = vpop.f32.mrb[11].mxu0 }
 0x109   :  { %355 = vst [vmem:[%s682_s3 + $0x68] sm:$0xff] %v261_v16  ;;  %v265_v21 = vadd.f32 %v264_v20, %v589_v43 }
 0x10a   :  { %357 = vst [vmem:[%s682_s3 + $0x78] sm:$0xff] %v263_v19 }
 0x10b   :  { %358 = vst [vmem:[%s682_s3 + $0x80] sm:$0xff] %v265_v21 }
 0x10d   :  { %v268_v22 = vpop.f32.mrb[12].mxu0 }
 0x10e   :  { %v269_v23 = vadd.f32 %v268_v22, %v587_v42  ;;  %v270_v24 = vpop.f32.mrb[13].mxu0 }
 0x10f   :  { %v271_v25 = vadd.f32 %v270_v24, %v589_v43  ;;  %v272_v26 = vpop.f32.mrb[14].mxu0 }
 0x110   :  { %360 = vst [vmem:[%s682_s3 + $0x90] sm:$0xff] %v269_v23  ;;  %v273_v27 = vadd.f32 %v272_v26, %v587_v42  ;;  %v274_v28 = vpop.f32.mrb[15].mxu0 }
 0x111   :  { %361 = vst [vmem:[%s682_s3 + $0x98] sm:$0xff] %v271_v25  ;;  %v275_v29 = vadd.f32 %v274_v28, %v589_v43 }
 0x112   :  { %363 = vst [vmem:[%s682_s3 + $0xa8] sm:$0xff] %v273_v27 }
 0x113   :  { %364 = vst [vmem:[%s682_s3 + $0xb0] sm:$0xff] %v275_v29 }

// kernel: noisegen_forward.5
= control target key start
LH: loop header
LB: loop body
LE: loop exit
PB: predicated region body
PF: predicated region fallthrough
CT: control target
= control target key end

     0   :  { %v1494_v1 = vmov 0.0   ;;  %v1495_v2 = vmov 0   ;;  %vm1496_vm0 = vmmov 0   ;;  %v1497_v25 = vmov 0.0|0.0   ;;  %s2075_s1 = inlined_call_operand.vmem [shape: bf16[128,384], index: 1, kind: input, shape index: {}]   ;;  %s2076_s0 = inlined_call_operand.vmem [shape: f32[8,8,384], index: 0, kind: input, shape index: {}]   ;;  %s2077_s2 = inlined_call_operand.vmem [shape: f32[1,128], index: 2, kind: input, shape index: {}]   ;;  %s2078_s3 = inlined_call_operand.vmem [shape: f32[8,8,128], index: 3, kind: output, shape index: {}]  }
   0x1   :  { %v1521_v0 = vld [vmem:[%s2075_s1 + $0x4] ss:$12 sps:$4 sm:$0xff]   ;;  %1212 = vmatprep.subr.bf16.mxu1 %v1494_v1  ;;  %224 = vmatprep.mubr.bf16.mxu0 %v1495_v2  ;;  %v1528_v3 = vld [vmem:[%s2075_s1] ss:$12 sps:$4 sm:$0xff]   ;;  %v1536_v4 = vld [vmem:[%s2075_s1 + $0x1c] ss:$12 sps:$4 sm:$0xff]  }
   0x2   :  { %1228 = vmatprep.mubr.msk.bf16.mxu1 %vm1496_vm0, %v1494_v1  ;;  %192 = vmatprep.subr.bf16.mxu0 %v1521_v0  ;;  %v1542_v5 = vld [vmem:[%s2075_s1 + $0x18] ss:$12 sps:$4 sm:$0xff]   ;;  %v1548_v6 = vld [vmem:[%s2075_s1 + $0x34] ss:$12 sps:$4 sm:$0xff]   ;;  %v1554_v7 = vld [vmem:[%s2075_s1 + $0x30] ss:$12 sps:$4 sm:$0xff]  }
   0x3   :  { %193 = vmatpush1.bf16.msra.mxu0 %v1528_v3  ;;  %v1560_v8 = vld [vmem:[%s2075_s1 + $0x4c] ss:$12 sps:$4 sm:$0xff]   ;;  %v1565_v9 = vld [vmem:[%s2075_s1 + $0x8] ss:$12 sps:$4 sm:$0xff]   ;;  %v1578_v11 = vld [vmem:[%s2075_s1 + $0x64] ss:$12 sps:$4 sm:$0xff]  }
   0x4   :  { %194 = vmatprep.subr.bf16.mxu0 %v1536_v4  ;;  %v1571_v10 = vld [vmem:[%s2075_s1 + $0x48] ss:$12 sps:$4 sm:$0xff]   ;;  %1213 = vmatpush3.bf16.msra.mxu1 %v1565_v9  ;;  %v1584_v12 = vld [vmem:[%s2075_s1 + $0x20] ss:$12 sps:$4 sm:$0xff]   ;;  %v1596_v14 = vld [vmem:[%s2075_s1 + $0x38] ss:$12 sps:$4 sm:$0xff]  }
   0x5   :  { %1214 = vmatprep.subr.bf16.mxu1 %v1494_v1  ;;  %v1589_v13 = vld [vmem:[%s2075_s1 + $0x60] ss:$12 sps:$4 sm:$0xff]   ;;  %v1602_v15 = vld [vmem:[%s2075_s1 + $0x7c] ss:$12 sps:$4 sm:$0xff]   ;;  %v1609_v16 = vld [vmem:[%s2075_s1 + $0x78] ss:$12 sps:$4 sm:$0xff]  }
   0x6   :  { %v1615_v17 = vld [vmem:[%s2075_s1 + $0x50] ss:$12 sps:$4 sm:$0xff]   ;;  %v1621_v18 = vld [vmem:[%s2075_s1 + $0x94] ss:$12 sps:$4 sm:$0xff]   ;;  %v1640_v21 = vld [vmem:[%s2075_s1 + $0xac] ss:$12 sps:$4 sm:$0xff]  }
   0x7   :  { %195 = vmatpush1.bf16.msra.mxu0 %v1542_v5  ;;  %v1628_v19 = vld [vmem:[%s2075_s1 + $0x90] ss:$12 sps:$4 sm:$0xff]   ;;  %v1634_v20 = vld [vmem:[%s2075_s1 + $0x68] ss:$12 sps:$4 sm:$0xff]   ;;  %v1653_v23 = vld [vmem:[%s2075_s1 + $0x80] ss:$12 sps:$4 sm:$0xff]  }
   0x8   :  { %196 = vmatprep.subr.bf16.mxu0 %v1548_v6  ;;  %1215 = vmatpush3.bf16.msra.mxu1 %v1584_v12  ;;  %v1647_v22 = vld [vmem:[%s2075_s1 + $0xa8] ss:$12 sps:$4 sm:$0xff]   ;;  %v1662_v24 = vld [vmem:[%s2075_s1 + $0x98] ss:$12 sps:$4 sm:$0xff]   ;;  %v1670_v26 = vld [vmem:[%s2075_s1 + $0xb0] ss:$12 sps:$4 sm:$0xff]  }
   0x9   :  { %1216 = vmatprep.subr.bf16.mxu1 %v1494_v1  ;;  %v60_v27 = vld [vmem:[%s2076_s0] sm:$0xff]  ;;  %v61_v30 = vld [vmem:[%s2076_s0 + $0x8] sm:$0xff]  ;;  %v62_v48 = vld [vmem:[%s2076_s0 + $0x10] sm:$0xff] }
   0xa   :  { %v1719_v44 = vld [vmem:[%s2077_s2] ss:$0 sm:$0xff]  ;;  %v1098_v58 = vld [vmem:[%s2076_s0 + $0x18] sm:$0xff] }
   0xb   :  { %197 = vmatpush1.bf16.msra.mxu0 %v1554_v7  ;;  %v1099_v62 = vld [vmem:[%s2076_s0 + $0x20] sm:$0xff] }
   0xc   :  { %198 = vmatprep.subr.bf16.mxu0 %v1560_v8  ;;  %1217 = vmatpush3.bf16.msra.mxu1 %v1596_v14 }
   0xd   :  { %1218 = vmatprep.subr.bf16.mxu1 %v1494_v1 }
   0xf   :  { %199 = vmatpush1.bf16.msra.mxu0 %v1571_v10 }
  0x10   :  { %200 = vmatprep.subr.bf16.mxu0 %v1578_v11  ;;  %1219 = vmatpush3.bf16.msra.mxu1 %v1615_v17 }
  0x11   :  { %1220 = vmatprep.subr.bf16.mxu1 %v1494_v1 }
  0x13   :  { %201 = vmatpush1.bf16.msra.mxu0 %v1589_v13 }
  0x14   :  { %202 = vmatprep.subr.bf16.mxu0 %v1602_v15  ;;  %1221 = vmatpush3.bf16.msra.mxu1 %v1634_v20 }
  0x15   :  { %1222 = vmatprep.subr.bf16.mxu1 %v1494_v1 }
  0x17   :  { %203 = vmatpush1.bf16.msra.mxu0 %v1609_v16 }
  0x18   :  { %204 = vmatprep.subr.bf16.mxu0 %v1621_v18  ;;  %1223 = vmatpush3.bf16.msra.mxu1 %v1653_v23 }
  0x19   :  { %1224 = vmatprep.subr.bf16.mxu1 %v1494_v1 }
  0x1b   :  { %205 = vmatpush1.bf16.msra.mxu0 %v1628_v19 }
  0x1c   :  { %206 = vmatprep.subr.bf16.mxu0 %v1640_v21  ;;  %1225 = vmatpush3.bf16.msra.mxu1 %v1662_v24 }
  0x1d   :  { %1226 = vmatprep.subr.bf16.mxu1 %v1494_v1 }
  0x1f   :  { %207 = vmatpush1.bf16.msra.mxu0 %v1647_v22 }
  0x20   :  { %301 = vmatprep.subr.bf16.mxu0 %v1521_v0  ;;  %1227 = vmatpush3.bf16.msra.mxu1 %v1670_v26 }
  0x21   :  { %1232 = vmatprep.subr.bf16.mxu1 %v1494_v1 }
  0x22   :  { %225 = vmatmul.mubr.bf16.vlgmr.msra.gmra.mrb[0].mxu0 %v1497_v25 }
  0x23   :  { %302 = vmatpush1.bf16.msra.mxu0 %v1528_v3  ;;  %333 = vmatprep.mubr.bf16.mxu0 %v1495_v2 }
  0x24   :  { %303 = vmatprep.subr.bf16.mxu0 %v1536_v4  ;;  %1229 = vmatmul.mubr.bf16.vlgmr.msra.gmra.mrb[0].mxu1 %v1497_v25 }
  0x25   :  { %1233 = vmatpush3.bf16.msra.mxu1 %v1565_v9  ;;  %1248 = vmatprep.mubr.msk.bf16.mxu1 %vm1496_vm0, %v1494_v1 }
  0x26   :  { %1234 = vmatprep.subr.bf16.mxu1 %v1494_v1 }
  0x27   :  { %304 = vmatpush1.bf16.msra.mxu0 %v1542_v5 }
  0x28   :  { %305 = vmatprep.subr.bf16.mxu0 %v1548_v6 }
  0x29   :  { %1235 = vmatpush3.bf16.msra.mxu1 %v1584_v12 }
  0x2a   :  { %1236 = vmatprep.subr.bf16.mxu1 %v1494_v1 }
  0x2b   :  { %306 = vmatpush1.bf16.msra.mxu0 %v1554_v7 }
  0x2c   :  { %307 = vmatprep.subr.bf16.mxu0 %v1560_v8 }
  0x2d   :  { %1237 = vmatpush3.bf16.msra.mxu1 %v1596_v14 }
  0x2e   :  { %1238 = vmatprep.subr.bf16.mxu1 %v1494_v1 }
  0x2f   :  { %308 = vmatpush1.bf16.msra.mxu0 %v1571_v10 }
  0x30   :  { %309 = vmatprep.subr.bf16.mxu0 %v1578_v11 }
  0x31   :  { %1239 = vmatpush3.bf16.msra.mxu1 %v1615_v17 }
  0x32   :  { %1240 = vmatprep.subr.bf16.mxu1 %v1494_v1 }
  0x33   :  { %310 = vmatpush1.bf16.msra.mxu0 %v1589_v13 }
  0x34   :  { %311 = vmatprep.subr.bf16.mxu0 %v1602_v15 }
  0x35   :  { %1241 = vmatpush3.bf16.msra.mxu1 %v1634_v20 }
  0x36   :  { %1242 = vmatprep.subr.bf16.mxu1 %v1494_v1 }
  0x37   :  { %312 = vmatpush1.bf16.msra.mxu0 %v1609_v16 }
  0x38   :  { %313 = vmatprep.subr.bf16.mxu0 %v1621_v18 }
  0x39   :  { %1243 = vmatpush3.bf16.msra.mxu1 %v1653_v23 }
  0x3a   :  { %1244 = vmatprep.subr.bf16.mxu1 %v1494_v1 }
  0x3b   :  { %314 = vmatpush1.bf16.msra.mxu0 %v1628_v19 }
  0x3c   :  { %315 = vmatprep.subr.bf16.mxu0 %v1640_v21 }
  0x3d   :  { %1245 = vmatpush3.bf16.msra.mxu1 %v1662_v24 }
  0x3e   :  { %1246 = vmatprep.subr.bf16.mxu1 %v1494_v1 }
  0x3f   :  { %316 = vmatpush1.bf16.msra.mxu0 %v1647_v22 }
  0x40   :  { %411 = vmatprep.subr.bf16.mxu0 %v1521_v0 }
  0x41   :  { %1247 = vmatpush3.bf16.msra.mxu1 %v1670_v26 }
  0x42   :  { %1252 = vmatprep.subr.bf16.mxu1 %v1494_v1 }
  0xf5   :  { %v226_v28 = vpop.f32.mrb[0].mxu0 }
  0xf6   :  { %v273_v29 = vadd.f32 %v226_v28, %v60_v27  ;;  %v228_v31 = vpop.f32.mrb[1].mxu0 }
  0xf7   :  { %v230_v32 = vpop.f32.mrb[2].mxu0  ;;  %v274_v35 = vadd.f32 %v228_v31, %v61_v30  ;;  %v267_v37 = vpop.f32.mrb[0].mxu1 }
  0xf8   :  { %v1096_v33 = vmul.f32 -1.442695, %v273_v29  ;;  %v231_v34 = vpop.f32.mrb[3].mxu0  ;;  %v1230_v38 = vpop.f32.mrb[1].mxu1  ;;  %v287_v46 = vadd.f32 %v1719_v44, %v267_v37 }
  0xf9   :  { %v1097_v36 = vmul.f32 -1.442695, %v274_v35  ;;  %v270_v39 = vpop.f32.mrb[2].mxu1 }
  0xfa   :  { %1408 = vpow2.f32 %v1096_v33  ;;  %v1231_v40 = vpop.f32.mrb[3].mxu1 }
  0xfb   :  { %1410 = vpow2.f32 %v1097_v36  ;;  %v1100_v40 = vld [vmem:[%s2076_s0 + $0x28] sm:$0xff] }
 0x104   :  { %v1409_v41 = vpop.eup %1408 }
 0x105   :  { %v281_v42 = vadd.f32 1.0, %v1409_v41  ;;  %v1411_v43 = vpop.eup %1410 }
 0x106   :  { %v282_v45 = vadd.f32 1.0, %v1411_v43 }
 0x107   :  { %1412 = vrcp.f32 %v281_v42 }
 0x108   :  { %1414 = vrcp.f32 %v282_v45 }
 0x111   :  { %v1413_v47 = vpop.eup %1412 }
 0x112   :  { %v288_v49 = vmul.f32 %v1413_v47, %v287_v46  ;;  %v1415_v51 = vpop.eup %1414 }
 0x113   :  { %v291_v52 = vsub.f32 1.0, %v1415_v51  ;;  %v293_v55 = vmul.f32 0.0, %v1415_v51  ;;  %v1104_v51 = vld [vmem:[%s2076_s0 + $0x30] sm:$0xff] }
 0x114   :  { %v289_v50 = vadd.f32 %v288_v49, %v62_v48 }
 0x116   :  { %1416 = vtanh.f32 %v289_v50 }
 0x120   :  { %v1417_v53 = vpop.eup %1416 }
 0x121   :  { %v292_v54 = vmul.f32 %v1417_v53, %v291_v52 }
 0x123   :  { %v1725_v56 = vadd.f32 %v293_v55, %v292_v54  ;;  %v1105_v55 = vld [vmem:[%s2076_s0 + $0x38] sm:$0xff] }
 0x125   :  { %295 = vst [vmem:[%s2078_s3] sm:$0xff] %v1725_v56  ;;  %v300_v57 = vpack.c.bf16 %v1725_v56, %v1725_v56 }
 0x127   :  { %334 = vmatmul.mubr.bf16.vlgmr.msra.gmra.mrb[4].mxu0 %v300_v57  ;;  %1249 = vmatmul.mubr.bf16.vlgmr.msra.gmra.mrb[4].mxu1 %v300_v57 }
 0x128   :  { %412 = vmatpush1.bf16.msra.mxu0 %v1528_v3  ;;  %1253 = vmatpush3.bf16.msra.mxu1 %v1565_v9 }
 0x129   :  { %413 = vmatprep.subr.bf16.mxu0 %v1536_v4  ;;  %1254 = vmatprep.subr.bf16.mxu1 %v1494_v1 }
 0x12a   :  { %443 = vmatprep.mubr.bf16.mxu0 %v1495_v2  ;;  %1268 = vmatprep.mubr.msk.bf16.mxu1 %vm1496_vm0, %v1494_v1 }
 0x12c   :  { %414 = vmatpush1.bf16.msra.mxu0 %v1542_v5  ;;  %1255 = vmatpush3.bf16.msra.mxu1 %v1584_v12 }
 0x12d   :  { %415 = vmatprep.subr.bf16.mxu0 %v1548_v6  ;;  %1256 = vmatprep.subr.bf16.mxu1 %v1494_v1 }
 0x130   :  { %416 = vmatpush1.bf16.msra.mxu0 %v1554_v7  ;;  %1257 = vmatpush3.bf16.msra.mxu1 %v1596_v14 }
 0x131   :  { %417 = vmatprep.subr.bf16.mxu0 %v1560_v8  ;;  %1258 = vmatprep.subr.bf16.mxu1 %v1494_v1 }
 0x134   :  { %418 = vmatpush1.bf16.msra.mxu0 %v1571_v10  ;;  %1259 = vmatpush3.bf16.msra.mxu1 %v1615_v17 }
 0x135   :  { %419 = vmatprep.subr.bf16.mxu0 %v1578_v11  ;;  %1260 = vmatprep.subr.bf16.mxu1 %v1494_v1 }
 0x138   :  { %420 = vmatpush1.bf16.msra.mxu0 %v1589_v13  ;;  %1261 = vmatpush3.bf16.msra.mxu1 %v1634_v20 }
 0x139   :  { %421 = vmatprep.subr.bf16.mxu0 %v1602_v15  ;;  %1262 = vmatprep.subr.bf16.mxu1 %v1494_v1 }
 0x13c   :  { %422 = vmatpush1.bf16.msra.mxu0 %v1609_v16  ;;  %1263 = vmatpush3.bf16.msra.mxu1 %v1653_v23 }
 0x13d   :  { %423 = vmatprep.subr.bf16.mxu0 %v1621_v18  ;;  %1264 = vmatprep.subr.bf16.mxu1 %v1494_v1 }
 0x140   :  { %424 = vmatpush1.bf16.msra.mxu0 %v1628_v19  ;;  %1265 = vmatpush3.bf16.msra.mxu1 %v1662_v24 }
 0x141   :  { %425 = vmatprep.subr.bf16.mxu0 %v1640_v21  ;;  %1266 = vmatprep.subr.bf16.mxu1 %v1494_v1 }
 0x144   :  { %426 = vmatpush1.bf16.msra.mxu0 %v1647_v22  ;;  %1267 = vmatpush3.bf16.msra.mxu1 %v1670_v26 }
 0x145   :  { %521 = vmatprep.subr.bf16.mxu0 %v1521_v0  ;;  %1272 = vmatprep.subr.bf16.mxu1 %v1494_v1 }
 0x1fa   :  { %v335_v59 = vpop.f32.mrb[4].mxu0  ;;  %v376_v60 = vpop.f32.mrb[4].mxu1 }
 0x1fb   :  { %v382_v61 = vadd.f32 %v1098_v58, %v335_v59  ;;  %v337_v63 = vpop.f32.mrb[5].mxu0  ;;  %v1250_v25 = vpop.f32.mrb[5].mxu1  ;;  %v396_v38 = vadd.f32 %v1719_v44, %v376_v60 }
 0x1fc   :  { %v339_v27 = vpop.f32.mrb[6].mxu0  ;;  %v379_v28 = vpop.f32.mrb[6].mxu1  ;;  %v383_v32 = vadd.f32 %v1099_v62, %v337_v63 }
 0x1fd   :  { %v1101_v29 = vmul.f32 -1.442695, %v382_v61  ;;  %v340_v30 = vpop.f32.mrb[7].mxu0  ;;  %v1251_v31 = vpop.f32.mrb[7].mxu1 }
 0x1fe   :  { %v1102_v33 = vmul.f32 -1.442695, %v383_v32 }
 0x1ff   :  { %1418 = vpow2.f32 %v1101_v29 }
 0x200   :  { %1420 = vpow2.f32 %v1102_v33  ;;  %v1106_v33 = vld [vmem:[%s2076_s0 + $0x40] sm:$0xff] }
 0x209   :  { %v1419_v34 = vpop.eup %1418 }
 0x20a   :  { %v390_v35 = vadd.f32 1.0, %v1419_v34  ;;  %v1421_v36 = vpop.eup %1420 }
 0x20b   :  { %v391_v37 = vadd.f32 1.0, %v1421_v36 }
 0x20c   :  { %1422 = vrcp.f32 %v390_v35 }
 0x20d   :  { %1424 = vrcp.f32 %v391_v37 }
 0x216   :  { %v1423_v39 = vpop.eup %1422 }
 0x217   :  { %v397_v41 = vmul.f32 %v1423_v39, %v396_v38  ;;  %v1425_v43 = vpop.eup %1424 }
 0x218   :  { %v400_v45 = vsub.f32 1.0, %v1425_v43  ;;  %v402_v48 = vmul.f32 %v1425_v43, %v1725_v56  ;;  %v1110_v43 = vld [vmem:[%s2076_s0 + $0x48] sm:$0xff] }
 0x219   :  { %v398_v42 = vadd.f32 %v1100_v40, %v397_v41 }
 0x21b   :  { %1426 = vtanh.f32 %v398_v42 }
 0x225   :  { %v1427_v46 = vpop.eup %1426 }
 0x226   :  { %v401_v47 = vmul.f32 %v1427_v46, %v400_v45 }
 0x228   :  { %v1779_v49 = vadd.f32 %v402_v48, %v401_v47  ;;  %v1111_v48 = vld [vmem:[%s2076_s0 + $0x50] sm:$0xff] }
 0x22a   :  { %1103 = vst [vmem:[%s2078_s3 + $0x8] sm:$0xff] %v1779_v49  ;;  %v410_v50 = vpack.c.bf16 %v1779_v49, %v1779_v49 }
 0x22c   :  { %444 = vmatmul.mubr.bf16.vlgmr.msra.gmra.mrb[8].mxu0 %v410_v50  ;;  %1269 = vmatmul.mubr.bf16.vlgmr.msra.gmra.mrb[8].mxu1 %v410_v50 }
 0x22d   :  { %522 = vmatpush1.bf16.msra.mxu0 %v1528_v3  ;;  %1273 = vmatpush3.bf16.msra.mxu1 %v1565_v9 }
 0x22e   :  { %523 = vmatprep.subr.bf16.mxu0 %v1536_v4  ;;  %1274 = vmatprep.subr.bf16.mxu1 %v1494_v1 }
 0x22f   :  { %553 = vmatprep.mubr.bf16.mxu0 %v1495_v2  ;;  %1288 = vmatprep.mubr.msk.bf16.mxu1 %vm1496_vm0, %v1494_v1 }
 0x231   :  { %524 = vmatpush1.bf16.msra.mxu0 %v1542_v5  ;;  %1275 = vmatpush3.bf16.msra.mxu1 %v1584_v12 }
 0x232   :  { %525 = vmatprep.subr.bf16.mxu0 %v1548_v6  ;;  %1276 = vmatprep.subr.bf16.mxu1 %v1494_v1 }
 0x235   :  { %526 = vmatpush1.bf16.msra.mxu0 %v1554_v7  ;;  %1277 = vmatpush3.bf16.msra.mxu1 %v1596_v14 }
 0x236   :  { %527 = vmatprep.subr.bf16.mxu0 %v1560_v8  ;;  %1278 = vmatprep.subr.bf16.mxu1 %v1494_v1 }
 0x239   :  { %528 = vmatpush1.bf16.msra.mxu0 %v1571_v10  ;;  %1279 = vmatpush3.bf16.msra.mxu1 %v1615_v17 }
 0x23a   :  { %529 = vmatprep.subr.bf16.mxu0 %v1578_v11  ;;  %1280 = vmatprep.subr.bf16.mxu1 %v1494_v1 }
 0x23d   :  { %530 = vmatpush1.bf16.msra.mxu0 %v1589_v13  ;;  %1281 = vmatpush3.bf16.msra.mxu1 %v1634_v20 }
 0x23e   :  { %531 = vmatprep.subr.bf16.mxu0 %v1602_v15  ;;  %1282 = vmatprep.subr.bf16.mxu1 %v1494_v1 }
 0x241   :  { %532 = vmatpush1.bf16.msra.mxu0 %v1609_v16  ;;  %1283 = vmatpush3.bf16.msra.mxu1 %v1653_v23 }
 0x242   :  { %533 = vmatprep.subr.bf16.mxu0 %v1621_v18  ;;  %1284 = vmatprep.subr.bf16.mxu1 %v1494_v1 }
 0x245   :  { %534 = vmatpush1.bf16.msra.mxu0 %v1628_v19  ;;  %1285 = vmatpush3.bf16.msra.mxu1 %v1662_v24 }
 0x246   :  { %535 = vmatprep.subr.bf16.mxu0 %v1640_v21  ;;  %1286 = vmatprep.subr.bf16.mxu1 %v1494_v1 }
 0x249   :  { %536 = vmatpush1.bf16.msra.mxu0 %v1647_v22  ;;  %1287 = vmatpush3.bf16.msra.mxu1 %v1670_v26 }
 0x24a   :  { %631 = vmatprep.subr.bf16.mxu0 %v1521_v0  ;;  %1292 = vmatprep.subr.bf16.mxu1 %v1494_v1 }
 0x2ff   :  { %v445_v52 = vpop.f32.mrb[8].mxu0  ;;  %v486_v53 = vpop.f32.mrb[8].mxu1 }
 0x300   :  { %v492_v54 = vadd.f32 %v1104_v51, %v445_v52  ;;  %v447_v56 = vpop.f32.mrb[9].mxu0  ;;  %v1270_v57 = vpop.f32.mrb[9].mxu1  ;;  %v506_v31 = vadd.f32 %v1719_v44, %v486_v53 }
 0x301   :  { %v449_v58 = vpop.f32.mrb[10].mxu0  ;;  %v489_v59 = vpop.f32.mrb[10].mxu1  ;;  %v493_v63 = vadd.f32 %v1105_v55, %v447_v56 }
 0x302   :  { %v1107_v60 = vmul.f32 -1.442695, %v492_v54  ;;  %v450_v61 = vpop.f32.mrb[11].mxu0  ;;  %v1271_v62 = vpop.f32.mrb[11].mxu1 }
 0x303   :  { %v1108_v25 = vmul.f32 -1.442695, %v493_v63 }
 0x304   :  { %1428 = vpow2.f32 %v1107_v60 }
 0x305   :  { %1430 = vpow2.f32 %v1108_v25  ;;  %v1112_v25 = vld [vmem:[%s2076_s0 + $0x58] sm:$0xff] }
 0x30e   :  { %v1429_v27 = vpop.eup %1428 }
 0x30f   :  { %v500_v28 = vadd.f32 1.0, %v1429_v27  ;;  %v1431_v29 = vpop.eup %1430 }
 0x310   :  { %v501_v30 = vadd.f32 1.0, %v1431_v29 }
 0x311   :  { %1432 = vrcp.f32 %v500_v28 }
 0x312   :  { %1434 = vrcp.f32 %v501_v30 }
 0x31b   :  { %v1433_v32 = vpop.eup %1432 }
 0x31c   :  { %v507_v34 = vmul.f32 %v1433_v32, %v506_v31  ;;  %v1435_v36 = vpop.eup %1434 }
 0x31d   :  { %v510_v37 = vsub.f32 1.0, %v1435_v36  ;;  %v512_v40 = vmul.f32 %v1435_v36, %v1779_v49  ;;  %v1116_v36 = vld [vmem:[%s2076_s0 + $0x60] sm:$0xff] }
 0x31e   :  { %v508_v35 = vadd.f32 %v1106_v33, %v507_v34 }
 0x320   :  { %1436 = vtanh.f32 %v508_v35 }
 0x32a   :  { %v1437_v38 = vpop.eup %1436 }
 0x32b   :  { %v511_v39 = vmul.f32 %v1437_v38, %v510_v37 }
 0x32d   :  { %v1833_v41 = vadd.f32 %v512_v40, %v511_v39  ;;  %v1117_v40 = vld [vmem:[%s2076_s0 + $0x68] sm:$0xff] }
 0x32f   :  { %1109 = vst [vmem:[%s2078_s3 + $0x10] sm:$0xff] %v1833_v41  ;;  %v520_v42 = vpack.c.bf16 %v1833_v41, %v1833_v41 }
 0x331   :  { %554 = vmatmul.mubr.bf16.vlgmr.msra.gmra.mrb[12].mxu0 %v520_v42  ;;  %1289 = vmatmul.mubr.bf16.vlgmr.msra.gmra.mrb[12].mxu1 %v520_v42 }
 0x332   :  { %632 = vmatpush1.bf16.msra.mxu0 %v1528_v3  ;;  %1293 = vmatpush3.bf16.msra.mxu1 %v1565_v9 }
 0x333   :  { %633 = vmatprep.subr.bf16.mxu0 %v1536_v4  ;;  %1294 = vmatprep.subr.bf16.mxu1 %v1494_v1 }
 0x334   :  { %663 = vmatprep.mubr.bf16.mxu0 %v1495_v2  ;;  %1308 = vmatprep.mubr.msk.bf16.mxu1 %vm1496_vm0, %v1494_v1 }
 0x336   :  { %634 = vmatpush1.bf16.msra.mxu0 %v1542_v5  ;;  %1295 = vmatpush3.bf16.msra.mxu1 %v1584_v12 }
 0x337   :  { %635 = vmatprep.subr.bf16.mxu0 %v1548_v6  ;;  %1296 = vmatprep.subr.bf16.mxu1 %v1494_v1 }
 0x33a   :  { %636 = vmatpush1.bf16.msra.mxu0 %v1554_v7  ;;  %1297 = vmatpush3.bf16.msra.mxu1 %v1596_v14 }
 0x33b   :  { %637 = vmatprep.subr.bf16.mxu0 %v1560_v8  ;;  %1298 = vmatprep.subr.bf16.mxu1 %v1494_v1 }
 0x33e   :  { %638 = vmatpush1.bf16.msra.mxu0 %v1571_v10  ;;  %1299 = vmatpush3.bf16.msra.mxu1 %v1615_v17 }
 0x33f   :  { %639 = vmatprep.subr.bf16.mxu0 %v1578_v11  ;;  %1300 = vmatprep.subr.bf16.mxu1 %v1494_v1 }
 0x342   :  { %640 = vmatpush1.bf16.msra.mxu0 %v1589_v13  ;;  %1301 = vmatpush3.bf16.msra.mxu1 %v1634_v20 }
 0x343   :  { %641 = vmatprep.subr.bf16.mxu0 %v1602_v15  ;;  %1302 = vmatprep.subr.bf16.mxu1 %v1494_v1 }
 0x346   :  { %642 = vmatpush1.bf16.msra.mxu0 %v1609_v16  ;;  %1303 = vmatpush3.bf16.msra.mxu1 %v1653_v23 }
 0x347   :  { %643 = vmatprep.subr.bf16.mxu0 %v1621_v18  ;;  %1304 = vmatprep.subr.bf16.mxu1 %v1494_v1 }
 0x34a   :  { %644 = vmatpush1.bf16.msra.mxu0 %v1628_v19  ;;  %1305 = vmatpush3.bf16.msra.mxu1 %v1662_v24 }
 0x34b   :  { %645 = vmatprep.subr.bf16.mxu0 %v1640_v21  ;;  %1306 = vmatprep.subr.bf16.mxu1 %v1494_v1 }
 0x34e   :  { %646 = vmatpush1.bf16.msra.mxu0 %v1647_v22  ;;  %1307 = vmatpush3.bf16.msra.mxu1 %v1670_v26 }
 0x34f   :  { %741 = vmatprep.subr.bf16.mxu0 %v1521_v0  ;;  %1312 = vmatprep.subr.bf16.mxu1 %v1494_v1 }
 0x404   :  { %v555_v45 = vpop.f32.mrb[12].mxu0  ;;  %v596_v46 = vpop.f32.mrb[12].mxu1 }
 0x405   :  { %v602_v47 = vadd.f32 %v1110_v43, %v555_v45  ;;  %v557_v49 = vpop.f32.mrb[13].mxu0  ;;  %v1290_v50 = vpop.f32.mrb[13].mxu1  ;;  %v616_v62 = vadd.f32 %v1719_v44, %v596_v46 }
 0x406   :  { %v559_v51 = vpop.f32.mrb[14].mxu0  ;;  %v599_v52 = vpop.f32.mrb[14].mxu1  ;;  %v603_v56 = vadd.f32 %v1111_v48, %v557_v49 }
 0x407   :  { %v1113_v53 = vmul.f32 -1.442695, %v602_v47  ;;  %v560_v54 = vpop.f32.mrb[15].mxu0  ;;  %v1291_v55 = vpop.f32.mrb[15].mxu1 }
 0x408   :  { %v1114_v57 = vmul.f32 -1.442695, %v603_v56 }
 0x409   :  { %1438 = vpow2.f32 %v1113_v53 }
 0x40a   :  { %1440 = vpow2.f32 %v1114_v57  ;;  %v1118_v57 = vld [vmem:[%s2076_s0 + $0x70] sm:$0xff] }
 0x413   :  { %v1439_v58 = vpop.eup %1438 }
 0x414   :  { %v610_v59 = vadd.f32 1.0, %v1439_v58  ;;  %v1441_v60 = vpop.eup %1440 }
 0x415   :  { %v611_v61 = vadd.f32 1.0, %v1441_v60 }
 0x416   :  { %1442 = vrcp.f32 %v610_v59 }
 0x417   :  { %1444 = vrcp.f32 %v611_v61 }
 0x420   :  { %v1443_v63 = vpop.eup %1442 }
 0x421   :  { %v617_v27 = vmul.f32 %v1443_v63, %v616_v62  ;;  %v1445_v29 = vpop.eup %1444 }
 0x422   :  { %v620_v30 = vsub.f32 1.0, %v1445_v29  ;;  %v622_v33 = vmul.f32 %v1445_v29, %v1833_v41 }
 0x423   :  { %v618_v28 = vadd.f32 %v1112_v25, %v617_v27 }
 0x425   :  { %1446 = vtanh.f32 %v618_v28 }
 0x42f   :  { %v1447_v31 = vpop.eup %1446 }
 0x430   :  { %v621_v32 = vmul.f32 %v1447_v31, %v620_v30 }
 0x432   :  { %v1887_v34 = vadd.f32 %v622_v33, %v621_v32 }
 0x434   :  { %1115 = vst [vmem:[%s2078_s3 + $0x18] sm:$0xff] %v1887_v34  ;;  %v630_v35 = vpack.c.bf16 %v1887_v34, %v1887_v34 }
 0x436   :  { %664 = vmatmul.mubr.bf16.vlgmr.msra.gmra.mrb[16].mxu0 %v630_v35  ;;  %1309 = vmatmul.mubr.bf16.vlgmr.msra.gmra.mrb[16].mxu1 %v630_v35 }
 0x437   :  { %742 = vmatpush1.bf16.msra.mxu0 %v1528_v3  ;;  %1313 = vmatpush3.bf16.msra.mxu1 %v1565_v9 }
 0x438   :  { %743 = vmatprep.subr.bf16.mxu0 %v1536_v4  ;;  %1314 = vmatprep.subr.bf16.mxu1 %v1494_v1 }
 0x439   :  { %773 = vmatprep.mubr.bf16.mxu0 %v1495_v2  ;;  %1328 = vmatprep.mubr.msk.bf16.mxu1 %vm1496_vm0, %v1494_v1 }
 0x43b   :  { %744 = vmatpush1.bf16.msra.mxu0 %v1542_v5  ;;  %1315 = vmatpush3.bf16.msra.mxu1 %v1584_v12 }
 0x43c   :  { %745 = vmatprep.subr.bf16.mxu0 %v1548_v6  ;;  %1316 = vmatprep.subr.bf16.mxu1 %v1494_v1 }
 0x43f   :  { %746 = vmatpush1.bf16.msra.mxu0 %v1554_v7  ;;  %1317 = vmatpush3.bf16.msra.mxu1 %v1596_v14 }
 0x440   :  { %747 = vmatprep.subr.bf16.mxu0 %v1560_v8  ;;  %1318 = vmatprep.subr.bf16.mxu1 %v1494_v1 }
 0x443   :  { %748 = vmatpush1.bf16.msra.mxu0 %v1571_v10  ;;  %1319 = vmatpush3.bf16.msra.mxu1 %v1615_v17 }
 0x444   :  { %749 = vmatprep.subr.bf16.mxu0 %v1578_v11  ;;  %1320 = vmatprep.subr.bf16.mxu1 %v1494_v1 }
 0x447   :  { %750 = vmatpush1.bf16.msra.mxu0 %v1589_v13  ;;  %1321 = vmatpush3.bf16.msra.mxu1 %v1634_v20 }
 0x448   :  { %751 = vmatprep.subr.bf16.mxu0 %v1602_v15  ;;  %1322 = vmatprep.subr.bf16.mxu1 %v1494_v1 }
 0x44b   :  { %752 = vmatpush1.bf16.msra.mxu0 %v1609_v16  ;;  %1323 = vmatpush3.bf16.msra.mxu1 %v1653_v23 }
 0x44c   :  { %753 = vmatprep.subr.bf16.mxu0 %v1621_v18  ;;  %1324 = vmatprep.subr.bf16.mxu1 %v1494_v1 }
 0x44f   :  { %754 = vmatpush1.bf16.msra.mxu0 %v1628_v19  ;;  %1325 = vmatpush3.bf16.msra.mxu1 %v1662_v24 }
 0x450   :  { %755 = vmatprep.subr.bf16.mxu0 %v1640_v21  ;;  %1326 = vmatprep.subr.bf16.mxu1 %v1494_v1 }
 0x453   :  { %756 = vmatpush1.bf16.msra.mxu0 %v1647_v22  ;;  %1327 = vmatpush3.bf16.msra.mxu1 %v1670_v26 }
 0x454   :  { %851 = vmatprep.subr.bf16.mxu0 %v1521_v0  ;;  %1332 = vmatprep.subr.bf16.mxu1 %v1494_v1 }
 0x509   :  { %v665_v37 = vpop.f32.mrb[16].mxu0  ;;  %v706_v38 = vpop.f32.mrb[16].mxu1 }
 0x50a   :  { %v712_v39 = vadd.f32 %v1116_v36, %v665_v37  ;;  %v667_v41 = vpop.f32.mrb[17].mxu0  ;;  %v1310_v42 = vpop.f32.mrb[17].mxu1  ;;  %v726_v55 = vadd.f32 %v1719_v44, %v706_v38 }
 0x50b   :  { %v669_v43 = vpop.f32.mrb[18].mxu0  ;;  %v709_v45 = vpop.f32.mrb[18].mxu1  ;;  %v713_v49 = vadd.f32 %v1117_v40, %v667_v41  ;;  %v1124_v42 = vld [vmem:[%s2076_s0 + $0x88] sm:$0xff] }
 0x50c   :  { %v1119_v46 = vmul.f32 -1.442695, %v712_v39  ;;  %v670_v47 = vpop.f32.mrb[19].mxu0  ;;  %v1311_v48 = vpop.f32.mrb[19].mxu1 }
 0x50d   :  { %v1120_v50 = vmul.f32 -1.442695, %v713_v49 }
 0x50e   :  { %1448 = vpow2.f32 %v1119_v46 }
 0x50f   :  { %1450 = vpow2.f32 %v1120_v50 }
 0x518   :  { %v1449_v51 = vpop.eup %1448 }
 0x519   :  { %v720_v52 = vadd.f32 1.0, %v1449_v51  ;;  %v1451_v53 = vpop.eup %1450 }
 0x51a   :  { %v721_v54 = vadd.f32 1.0, %v1451_v53  ;;  %v1488_v53 = vld [vmem:[%s2075_s1] ss:$12 sps:$4 sm:$0xff]  }
 0x51b   :  { %1452 = vrcp.f32 %v720_v52 }
 0x51c   :  { %1454 = vrcp.f32 %v721_v54  ;;  %v1489_v54 = vld [vmem:[%s2075_s1 + $0x1c] ss:$12 sps:$4 sm:$0xff]  }
 0x525   :  { %v1453_v56 = vpop.eup %1452 }
 0x526   :  { %v727_v58 = vmul.f32 %v1453_v56, %v726_v55  ;;  %v1455_v60 = vpop.eup %1454  ;;  %v1490_v55 = vld [vmem:[%s2075_s1 + $0x18] ss:$12 sps:$4 sm:$0xff]  }
 0x527   :  { %v730_v61 = vsub.f32 1.0, %v1455_v60  ;;  %v732_v25 = vmul.f32 %v1455_v60, %v1887_v34  ;;  %v1493_v56 = vld [vmem:[%s2075_s1 + $0x4c] ss:$12 sps:$4 sm:$0xff]   ;;  %v1130_v60 = vld [vmem:[%s2076_s0 + $0xa0] sm:$0xff] }
 0x528   :  { %v728_v59 = vadd.f32 %v1118_v57, %v727_v58 }
 0x52a   :  { %1456 = vtanh.f32 %v728_v59 }
 0x534   :  { %v1457_v62 = vpop.eup %1456 }
 0x535   :  { %v731_v63 = vmul.f32 %v1457_v62, %v730_v61 }
 0x537   :  { %v1941_v27 = vadd.f32 %v732_v25, %v731_v63 }
 0x539   :  { %1121 = vst [vmem:[%s2078_s3 + $0x20] sm:$0xff] %v1941_v27  ;;  %v740_v28 = vpack.c.bf16 %v1941_v27, %v1941_v27 }
 0x53b   :  { %774 = vmatmul.mubr.bf16.vlgmr.msra.gmra.mrb[20].mxu0 %v740_v28  ;;  %1329 = vmatmul.mubr.bf16.vlgmr.msra.gmra.mrb[20].mxu1 %v740_v28 }
 0x53c   :  { %852 = vmatpush1.bf16.msra.mxu0 %v1528_v3  ;;  %1333 = vmatpush3.bf16.msra.mxu1 %v1565_v9  ;;  %v1122_v3 = vld [vmem:[%s2076_s0 + $0x78] sm:$0xff] }
 0x53d   :  { %853 = vmatprep.subr.bf16.mxu0 %v1536_v4  ;;  %1334 = vmatprep.subr.bf16.mxu1 %v1494_v1 }
 0x53e   :  { %883 = vmatprep.mubr.bf16.mxu0 %v1495_v2  ;;  %1348 = vmatprep.mubr.msk.bf16.mxu1 %vm1496_vm0, %v1494_v1 }
 0x540   :  { %854 = vmatpush1.bf16.msra.mxu0 %v1542_v5  ;;  %1335 = vmatpush3.bf16.msra.mxu1 %v1584_v12 }
 0x541   :  { %855 = vmatprep.subr.bf16.mxu0 %v1548_v6  ;;  %1336 = vmatprep.subr.bf16.mxu1 %v1494_v1 }
 0x544   :  { %856 = vmatpush1.bf16.msra.mxu0 %v1554_v7  ;;  %1337 = vmatpush3.bf16.msra.mxu1 %v1596_v14  ;;  %v1123_v7 = vld [vmem:[%s2076_s0 + $0x80] sm:$0xff] }
 0x545   :  { %857 = vmatprep.subr.bf16.mxu0 %v1560_v8  ;;  %1338 = vmatprep.subr.bf16.mxu1 %v1494_v1 }
 0x548   :  { %858 = vmatpush1.bf16.msra.mxu0 %v1571_v10  ;;  %1339 = vmatpush3.bf16.msra.mxu1 %v1615_v17 }
 0x549   :  { %859 = vmatprep.subr.bf16.mxu0 %v1578_v11  ;;  %1340 = vmatprep.subr.bf16.mxu1 %v1494_v1 }
 0x54c   :  { %860 = vmatpush1.bf16.msra.mxu0 %v1589_v13  ;;  %1341 = vmatpush3.bf16.msra.mxu1 %v1634_v20 }
 0x54d   :  { %861 = vmatprep.subr.bf16.mxu0 %v1602_v15  ;;  %1342 = vmatprep.subr.bf16.mxu1 %v1494_v1 }
 0x550   :  { %862 = vmatpush1.bf16.msra.mxu0 %v1609_v16  ;;  %1343 = vmatpush3.bf16.msra.mxu1 %v1653_v23 }
 0x551   :  { %863 = vmatprep.subr.bf16.mxu0 %v1621_v18  ;;  %1344 = vmatprep.subr.bf16.mxu1 %v1494_v1 }
 0x554   :  { %864 = vmatpush1.bf16.msra.mxu0 %v1628_v19  ;;  %1345 = vmatpush3.bf16.msra.mxu1 %v1662_v24 }
 0x555   :  { %865 = vmatprep.subr.bf16.mxu0 %v1640_v21  ;;  %1346 = vmatprep.subr.bf16.mxu1 %v1494_v1 }
 0x558   :  { %866 = vmatpush1.bf16.msra.mxu0 %v1647_v22  ;;  %1347 = vmatpush3.bf16.msra.mxu1 %v1670_v26 }
 0x559   :  { %961 = vmatprep.subr.bf16.mxu0 %v1521_v0  ;;  %1352 = vmatprep.subr.bf16.mxu1 %v1494_v1 }
 0x60e   :  { %v775_v4 = vpop.f32.mrb[20].mxu0  ;;  %v816_v5 = vpop.f32.mrb[20].mxu1 }
 0x60f   :  { %v822_v6 = vadd.f32 %v1122_v3, %v775_v4  ;;  %v777_v8 = vpop.f32.mrb[21].mxu0  ;;  %v1330_v29 = vpop.f32.mrb[21].mxu1  ;;  %v836_v40 = vadd.f32 %v1719_v44, %v816_v5 }
 0x610   :  { %v779_v30 = vpop.f32.mrb[22].mxu0  ;;  %v819_v31 = vpop.f32.mrb[22].mxu1  ;;  %v823_v34 = vadd.f32 %v1123_v7, %v777_v8 }
 0x611   :  { %v1125_v32 = vmul.f32 -1.442695, %v822_v6  ;;  %v780_v33 = vpop.f32.mrb[23].mxu0  ;;  %v1331_v0 = vpop.f32.mrb[23].mxu1  ;;  %v1134_v6 = vld [vmem:[%s2076_s0 + $0xa8] sm:$0xff]  ;;  %v1135_v30 = vld [vmem:[%s2076_s0 + $0xb0] sm:$0xff] }
 0x612   :  { %v1126_v35 = vmul.f32 -1.442695, %v823_v34 }
 0x613   :  { %1458 = vpow2.f32 %v1125_v32 }
 0x614   :  { %1460 = vpow2.f32 %v1126_v35 }
 0x61d   :  { %v1459_v36 = vpop.eup %1458 }
 0x61e   :  { %v830_v37 = vadd.f32 1.0, %v1459_v36  ;;  %v1461_v38 = vpop.eup %1460 }
 0x61f   :  { %v831_v39 = vadd.f32 1.0, %v1461_v38 }
 0x620   :  { %1462 = vrcp.f32 %v830_v37 }
 0x621   :  { %1464 = vrcp.f32 %v831_v39 }
 0x62a   :  { %v1463_v41 = vpop.eup %1462 }
 0x62b   :  { %v837_v43 = vmul.f32 %v1463_v41, %v836_v40  ;;  %v1465_v46 = vpop.eup %1464 }
 0x62c   :  { %v840_v47 = vsub.f32 1.0, %v1465_v46  ;;  %v842_v50 = vmul.f32 %v1465_v46, %v1941_v27  ;;  %v1136_v46 = vld [vmem:[%s2076_s0 + $0xb8] sm:$0xff] }
 0x62d   :  { %v838_v45 = vadd.f32 %v1124_v42, %v837_v43 }
 0x62f   :  { %1466 = vtanh.f32 %v838_v45 }
 0x639   :  { %v1467_v48 = vpop.eup %1466 }
 0x63a   :  { %v841_v49 = vmul.f32 %v1467_v48, %v840_v47 }
 0x63c   :  { %v1995_v51 = vadd.f32 %v842_v50, %v841_v49 }
 0x63e   :  { %1127 = vst [vmem:[%s2078_s3 + $0x28] sm:$0xff] %v1995_v51  ;;  %v850_v52 = vpack.c.bf16 %v1995_v51, %v1995_v51 }
 0x640   :  { %884 = vmatmul.mubr.bf16.vlgmr.msra.gmra.mrb[24].mxu0 %v850_v52  ;;  %1349 = vmatmul.mubr.bf16.vlgmr.msra.gmra.mrb[24].mxu1 %v850_v52 }
 0x641   :  { %962 = vmatpush1.bf16.msra.mxu0 %v1488_v53  ;;  %1353 = vmatpush3.bf16.msra.mxu1 %v1565_v9  ;;  %v1491_v9 = vld [vmem:[%s2075_s1 + $0x34] ss:$12 sps:$4 sm:$0xff]  }
 0x642   :  { %963 = vmatprep.subr.bf16.mxu0 %v1489_v54  ;;  %1354 = vmatprep.subr.bf16.mxu1 %v1494_v1 }
 0x643   :  { %993 = vmatprep.mubr.bf16.mxu0 %v1495_v2  ;;  %1368 = vmatprep.mubr.msk.bf16.mxu1 %vm1496_vm0, %v1494_v1  ;;  %v1492_v2 = vld [vmem:[%s2075_s1 + $0x30] ss:$12 sps:$4 sm:$0xff]  }
 0x645   :  { %964 = vmatpush1.bf16.msra.mxu0 %v1490_v55  ;;  %1355 = vmatpush3.bf16.msra.mxu1 %v1584_v12 }
 0x646   :  { %965 = vmatprep.subr.bf16.mxu0 %v1491_v9  ;;  %1356 = vmatprep.subr.bf16.mxu1 %v1494_v1 }
 0x649   :  { %966 = vmatpush1.bf16.msra.mxu0 %v1492_v2  ;;  %1357 = vmatpush3.bf16.msra.mxu1 %v1596_v14  ;;  %v1129_v14 = vld [vmem:[%s2076_s0 + $0x98] sm:$0xff] }
 0x64a   :  { %967 = vmatprep.subr.bf16.mxu0 %v1493_v56  ;;  %1358 = vmatprep.subr.bf16.mxu1 %v1494_v1 }
 0x64d   :  { %968 = vmatpush1.bf16.msra.mxu0 %v1571_v10  ;;  %1359 = vmatpush3.bf16.msra.mxu1 %v1615_v17  ;;  %v1128_v10 = vld [vmem:[%s2076_s0 + $0x90] sm:$0xff] }
 0x64e   :  { %969 = vmatprep.subr.bf16.mxu0 %v1578_v11  ;;  %1360 = vmatprep.subr.bf16.mxu1 %v1494_v1 }
 0x651   :  { %970 = vmatpush1.bf16.msra.mxu0 %v1589_v13  ;;  %1361 = vmatpush3.bf16.msra.mxu1 %v1634_v20 }
 0x652   :  { %971 = vmatprep.subr.bf16.mxu0 %v1602_v15  ;;  %1362 = vmatprep.subr.bf16.mxu1 %v1494_v1 }
 0x655   :  { %972 = vmatpush1.bf16.msra.mxu0 %v1609_v16  ;;  %1363 = vmatpush3.bf16.msra.mxu1 %v1653_v23 }
 0x656   :  { %973 = vmatprep.subr.bf16.mxu0 %v1621_v18  ;;  %1364 = vmatprep.subr.bf16.mxu1 %v1494_v1 }
 0x659   :  { %974 = vmatpush1.bf16.msra.mxu0 %v1628_v19  ;;  %1365 = vmatpush3.bf16.msra.mxu1 %v1662_v24 }
 0x65a   :  { %975 = vmatprep.subr.bf16.mxu0 %v1640_v21  ;;  %1366 = vmatprep.subr.bf16.mxu1 %v1494_v1 }
 0x65d   :  { %976 = vmatpush1.bf16.msra.mxu0 %v1647_v22  ;;  %1367 = vmatpush3.bf16.msra.mxu1 %v1670_v26 }
 0x713   :  { %v885_v11 = vpop.f32.mrb[24].mxu0  ;;  %v926_v12 = vpop.f32.mrb[24].mxu1 }
 0x714   :  { %v932_v13 = vadd.f32 %v1128_v10, %v885_v11  ;;  %v887_v15 = vpop.f32.mrb[25].mxu0  ;;  %v1350_v16 = vpop.f32.mrb[25].mxu1  ;;  %v946_v58 = vadd.f32 %v1719_v44, %v926_v12 }
 0x715   :  { %v889_v17 = vpop.f32.mrb[26].mxu0  ;;  %v929_v18 = vpop.f32.mrb[26].mxu1  ;;  %v933_v21 = vadd.f32 %v1129_v14, %v887_v15 }
 0x716   :  { %v1131_v1 = vmul.f32 -1.442695, %v932_v13  ;;  %v890_v19 = vpop.f32.mrb[27].mxu0  ;;  %v1351_v20 = vpop.f32.mrb[27].mxu1 }
 0x717   :  { %v1132_v22 = vmul.f32 -1.442695, %v933_v21 }
 0x718   :  { %1468 = vpow2.f32 %v1131_v1 }
 0x719   :  { %1470 = vpow2.f32 %v1132_v22 }
 0x722   :  { %v1469_v23 = vpop.eup %1468 }
 0x723   :  { %v940_v24 = vadd.f32 1.0, %v1469_v23  ;;  %v1471_v26 = vpop.eup %1470 }
 0x724   :  { %v941_v57 = vadd.f32 1.0, %v1471_v26 }
 0x725   :  { %1472 = vrcp.f32 %v940_v24 }
 0x726   :  { %1474 = vrcp.f32 %v941_v57 }
 0x72f   :  { %v1473_v59 = vpop.eup %1472 }
 0x730   :  { %v947_v61 = vmul.f32 %v1473_v59, %v946_v58  ;;  %v1475_v63 = vpop.eup %1474 }
 0x731   :  { %v950_v25 = vsub.f32 1.0, %v1475_v63  ;;  %v952_v3 = vmul.f32 %v1475_v63, %v1995_v51 }
 0x732   :  { %v948_v62 = vadd.f32 %v1130_v60, %v947_v61 }
 0x734   :  { %1476 = vtanh.f32 %v948_v62 }
 0x73e   :  { %v1477_v27 = vpop.eup %1476 }
 0x73f   :  { %v951_v28 = vmul.f32 %v1477_v27, %v950_v25 }
 0x741   :  { %v953_v4 = vadd.f32 %v952_v3, %v951_v28 }
 0x743   :  { %1133 = vst [vmem:[%s2078_s3 + $0x30] sm:$0xff] %v953_v4  ;;  %v960_v5 = vpack.c.bf16 %v953_v4, %v953_v4 }
 0x745   :  { %994 = vmatmul.mubr.bf16.vlgmr.msra.gmra.mrb[28].mxu0 %v960_v5  ;;  %1369 = vmatmul.mubr.bf16.vlgmr.msra.gmra.mrb[28].mxu1 %v960_v5 }
 0x818   :  { %v995_v7 = vpop.f32.mrb[28].mxu0  ;;  %v1036_v8 = vpop.f32.mrb[28].mxu1 }
 0x819   :  { %v1042_v29 = vadd.f32 %v1134_v6, %v995_v7  ;;  %v997_v31 = vpop.f32.mrb[29].mxu0  ;;  %v1370_v32 = vpop.f32.mrb[29].mxu1  ;;  %v1056_v43 = vadd.f32 %v1719_v44, %v1036_v8 }
 0x81a   :  { %v999_v33 = vpop.f32.mrb[30].mxu0  ;;  %v1039_v0 = vpop.f32.mrb[30].mxu1  ;;  %v1043_v37 = vadd.f32 %v1135_v30, %v997_v31 }
 0x81b   :  { %v1137_v34 = vmul.f32 -1.442695, %v1042_v29  ;;  %v1000_v35 = vpop.f32.mrb[31].mxu0  ;;  %v1371_v36 = vpop.f32.mrb[31].mxu1 }
 0x81c   :  { %v1138_v38 = vmul.f32 -1.442695, %v1043_v37 }
 0x81d   :  { %1478 = vpow2.f32 %v1137_v34 }
 0x81e   :  { %1480 = vpow2.f32 %v1138_v38 }
 0x827   :  { %v1479_v39 = vpop.eup %1478 }
 0x828   :  { %v1050_v40 = vadd.f32 1.0, %v1479_v39  ;;  %v1481_v41 = vpop.eup %1480 }
 0x829   :  { %v1051_v42 = vadd.f32 1.0, %v1481_v41 }
 0x82a   :  { %1482 = vrcp.f32 %v1050_v40 }
 0x82b   :  { %1484 = vrcp.f32 %v1051_v42 }
 0x834   :  { %v1483_v45 = vpop.eup %1482 }
 0x835   :  { %v1057_v47 = vmul.f32 %v1483_v45, %v1056_v43  ;;  %v1485_v49 = vpop.eup %1484 }
 0x836   :  { %v1060_v50 = vsub.f32 1.0, %v1485_v49  ;;  %v1062_v53 = vmul.f32 %v1485_v49, %v953_v4 }
 0x837   :  { %v1058_v48 = vadd.f32 %v1136_v46, %v1057_v47 }
 0x839   :  { %1486 = vtanh.f32 %v1058_v48 }
 0x843   :  { %v1487_v51 = vpop.eup %1486 }
 0x844   :  { %v1061_v52 = vmul.f32 %v1487_v51, %v1060_v50 }
 0x846   :  { %v1063_v54 = vadd.f32 %v1062_v53, %v1061_v52 }
 0x848   :  { %1139 = vst [vmem:[%s2078_s3 + $0x38] sm:$0xff] %v1063_v54 }

</bundles_post_ra>
